<compile_context>
chip_gen: v6e
topology: v6e:2x2x1
jax: 0.10.0
libtpu: 0.0.40
codegen_flags: <defaults>
</compile_context>

<pallas_src>
import jax
import jax.numpy as jnp
from jax.experimental import pallas as pl
from jax.experimental.pallas import tpu as pltpu


def _sinu_kernel(scale_ref, inv_freq_ref, out_ref):
    # scale_ref   : SMEM (1,)            learnable scalar (init = 1.0)
    # inv_freq_ref: VMEM (1, dim//2)     frequency buffer (constant across steps)
    # out_ref     : VMEM (tile_n, dim)   output row-slab for this grid step
    i = pl.program_id(0)
    tile_n = out_ref.shape[0]
    half = inv_freq_ref.shape[1]

    # Exact integer positions for this slab, cast afterwards
    # (matches torch.arange(n).type_as(inv_freq) for any n).
    rows = jax.lax.broadcasted_iota(jnp.int32, (tile_n, half), 0) + i * tile_n
    pos = rows.astype(jnp.float32)

    sinu = pos * inv_freq_ref[...]          # outer(t, inv_freq) for this slab
    scale = scale_ref[0]

    # Build the full (tile_n, dim) row in registers -> one lane-dense store.
    emb = jnp.concatenate([jnp.sin(sinu), jnp.cos(sinu)], axis=-1) * scale
    out_ref[...] = emb.astype(out_ref.dtype)


def _round_up(x: int, m: int) -> int:
    return ((x + m - 1) // m) * m


def scaled_sinu_embedding(n: int, dim: int, scale: jax.Array, inv_freq: jax.Array,
                          *, out_dtype=jnp.float32, max_tile_rows: int = 1024,
                          vmem_budget_bytes: int = 8 * 1024 * 1024) -> jax.Array:
    """Pallas implementation of ScaledSinuEmbedding.forward(n, device)."""
    assert dim % 2 == 0
    half = dim // 2
    assert inv_freq.shape == (half,)

    # Row-slab sizing: biggest slab whose double-buffered output fits the VMEM
    # budget, capped at max_tile_rows, kept a multiple of 8 sublanes.
    bytes_per_row = dim * jnp.dtype(out_dtype).itemsize
    cap = max(8, ((vmem_budget_bytes // (2 * bytes_per_row)) // 8) * 8)
    tile_n = min(_round_up(n, 8), cap, max_tile_rows)

    grid = (pl.cdiv(n, tile_n),)
    n_pad = grid[0] * tile_n            # pad rows so every slab is full width

    inv_freq_2d = inv_freq.reshape(1, half).astype(jnp.float32)
    scale_1d = scale.reshape(1).astype(jnp.float32)

    out = pl.pallas_call(
        _sinu_kernel,
        out_shape=jax.ShapeDtypeStruct((n_pad, dim), out_dtype),
        grid_spec=pltpu.PrefetchScalarGridSpec(
            num_scalar_prefetch=0,
            grid=grid,
            in_specs=[
                # scalar parameter lives in SMEM (whole (1,) array, no tiling)
                pl.BlockSpec(memory_space=pltpu.MemorySpace.SMEM),
                # inv_freq: full (1, half) block, constant index_map -> no re-DMA
                pl.BlockSpec((1, half), lambda i: (0, 0)),
            ],
            out_specs=pl.BlockSpec((tile_n, dim), lambda i: (i, 0)),
        ),
        compiler_params=pltpu.CompilerParams(
            dimension_semantics=("parallel",),
        ),
    )(scale_1d, inv_freq_2d)

    return out if n_pad == n else out[:n]


def _reference(n: int, dim: int, scale: jax.Array, inv_freq: jax.Array) -> jax.Array:
    t = jnp.arange(n, dtype=jnp.float32)
    sinu = jnp.einsum("i,j->ij", t, inv_freq.astype(jnp.float32))
    emb = jnp.concatenate([jnp.sin(sinu), jnp.cos(sinu)], axis=-1)
    return emb * scale.astype(jnp.float32)


if __name__ == "__main__":
    # Parameters / buffers exactly as in ScaledSinuEmbedding.__init__:
    #   self.scale    = nn.Parameter(torch.ones(1))
    #   self.inv_freq = 1.0 / 10000 ** (arange(0, dim, 2) / dim)
    key = jax.random.PRNGKey(0)   # unused: init is deterministic (ones / formula)
    del key

    def init_params(dim):
        scale = jnp.ones((1,), dtype=jnp.float32)
        inv_freq = 1.0 / (10000.0 ** (jnp.arange(0, dim, 2, dtype=jnp.float32) / dim))
        return scale, inv_freq

    # Config 1: small dim, n not a multiple of the forced tile -> exercises the
    #           padded last slab + wrapper slice (multi-step grid).
    # Config 2: lane-dense case (half = 128) -> unmasked full-width stores,
    #           single grid step (default tile sizing).
    configs = [
        dict(n=200, dim=64, max_tile_rows=128),
        dict(n=128, dim=256, max_tile_rows=1024),
    ]

    for cfg in configs:
        n, dim = cfg["n"], cfg["dim"]
        scale, inv_freq = init_params(dim)
        out = scaled_sinu_embedding(n, dim, scale, inv_freq,
                                    max_tile_rows=cfg["max_tile_rows"])
        out = jax.block_until_ready(out)

        ref = _reference(n, dim, scale, inv_freq)
        assert out.shape == (n, dim), out.shape
        err = float(jnp.max(jnp.abs(out - ref)))
        assert jnp.allclose(out, ref, atol=1e-5, rtol=1e-5), f"max abs err = {err}"

    print("KERNEL_OK")
</pallas_src>

<mosaic_0001>
module attributes {stable_mosaic.version = 11 : i64} {
  func.func @_sinu_kernel(%arg0: i32, %arg1: memref<1xf32, #tpu.memory_space<smem>>, %arg2: memref<1x32xf32, #tpu.memory_space<vmem>>, %arg3: memref<128x64xf32, #tpu.memory_space<vmem>>) attributes {dimension_semantics = [#tpu.dimension_semantics<parallel>], iteration_bounds = array<i64: 2>, scalar_prefetch = 0 : i64, scratch_operands = 0 : i64, tpu.core_type = #tpu.core_type<tc>, window_params = [{transform_indices = @transform_0, window_bounds = array<i64: 1>}, {pipeline_mode = #tpu.pipeline_mode<synchronous>, transform_indices = @transform_1, window_bounds = array<i64: 1, 32>}, {transform_indices = @transform_2, window_bounds = array<i64: 128, 64>}]} {
    %0 = tpu.iota {dimensions = array<i32: 0>} : vector<128x32xi32>
    %c128_i32 = arith.constant 128 : i32
    %1 = arith.muli %arg0, %c128_i32 : i32
    %2 = vector.broadcast %1 : i32 to vector<128x32xi32>
    %3 = arith.addi %0, %2 : vector<128x32xi32>
    %4 = arith.sitofp %3 : vector<128x32xi32> to vector<128x32xf32>
    %c0 = arith.constant 0 : index
    %c0_0 = arith.constant 0 : index
    %5 = vector.load %arg2[%c0, %c0_0] : memref<1x32xf32, #tpu.memory_space<vmem>>, vector<1x32xf32>
    %6 = vector.broadcast %5 : vector<1x32xf32> to vector<128x32xf32>
    %7 = arith.mulf %4, %6 : vector<128x32xf32>
    %c0_1 = arith.constant 0 : index
    %8 = memref.load %arg1[%c0_1] : memref<1xf32, #tpu.memory_space<smem>>
    %9 = math.sin %7 : vector<128x32xf32>
    %10 = math.cos %7 : vector<128x32xf32>
    %11 = tpu.concatenate %9, %10 in 1 : vector<128x32xf32>, vector<128x32xf32> -> vector<128x64xf32>
    %12 = vector.broadcast %8 : f32 to vector<128x64xf32>
    %13 = arith.mulf %11, %12 : vector<128x64xf32>
    %c0_2 = arith.constant 0 : index
    %c0_3 = arith.constant 0 : index
    %14 = vector.load %arg3[%c0_2, %c0_3] : memref<128x64xf32, #tpu.memory_space<vmem>>, vector<128x64xf32>
    tpu.vector_store %arg3[%c0_2, %c0_3], %13 {strides = array<i32>} : memref<128x64xf32, #tpu.memory_space<vmem>>, vector<128x64xf32>,
    return
  }
  func.func @transform_0(%arg0: i32) -> i32 {
    %c0_i32 = arith.constant 0 : i32
    %c0_i32_0 = arith.constant 0 : i32
    return %c0_i32 : i32
  }
  func.func @transform_1(%arg0: i32) -> (i32, i32) {
    %c0_i32 = arith.constant 0 : i32
    %c0_i32_0 = arith.constant 0 : i32
    %c0_i32_1 = arith.constant 0 : i32
    return %c0_i32, %c0_i32_0 : i32, i32
  }
  func.func @transform_2(%arg0: i32) -> (i32, i32) {
    %c0_i32 = arith.constant 0 : i32
    %c0_i32_0 = arith.constant 0 : i32
    return %arg0, %c0_i32 : i32, i32
  }
}

</mosaic_0001>

<bundles_post_ra>
// kernel: tpu_custom_call.1
= control target key start
LH: loop header
LB: loop body
LE: loop exit
PB: predicated region body
PF: predicated region fallthrough
CT: control target
= control target key end

     0   :  { %s3988_s11 = smov 0   ;;  %s5745_s0 = inlined_call_operand.<no memory space> [shape: f32[1], index: 0, kind: input, shape index: {}]   ;;  %s5746_s1 = inlined_call_operand.vmem [shape: f32[1,32], index: 1, kind: input, shape index: {}]   ;;  %s5747_s2 = inlined_call_operand.vmem [shape: f32[256,64], index: 2, kind: output, shape index: {}]  }
   0x1   :  { %7 = sst [smem:[#allocation2]] %s5745_s0 }
   0x2 LB: > { %s3672_s12 = sadd.s32 4294967295, %s3961_s11   ;;  %p3675_p0 = scmp.ge.s32.totalorder %s3961_s11, 1  ;;  %s3961_s11 = sphi %s3988_s11, %s13_s11  }
   0x3   : > { %p103_p1 = scmp.lt.s32.totalorder %s3961_s11, 3 }
   0x5   : > { %p104_p2 = pnand %p3675_p0, %p103_p1 }
   0x6   : > { %s3678_s13 = sshll.u32 (!%p104_p2), %s3672_s12, 7  ;;  %s3969_s15 = smov (!%p104_p2), 32  }
   0x7   : > { %107 = sbr.rel (%p104_p2) target bundleno = 618 (0x26a), region = 28  ;;  %s5470_s20 = sshll.u32 (!%p104_p2), %s3672_s12, 4 }
   0x8   : > { %p121_p3 = scmp.lt.s32.totalorder (!%p104_p2), %s5470_s20, 31  ;;  %s5478_s21 = sld [smem:[#allocation2]] (!%p104_p2) }
   0xc   : > { %v126_v0 = vlaneseq  ;;  %v3998_v1 = vstv %s3678_s13  ;;  %v4009_v6 = vld [vmem:[%s5746_s1] ss:$0 sm:$0xff]  ;;  %v3963_v42 = vmov 683565275   ;;  %v3964_v44 = vmov 2475754826  }
   0xd   : > { %v3965_v46 = vmov 2131351028   ;;  %v3966_v48 = vmov 2102212464   ;;  %v3967_v50 = vmov 920167782  }
   0xe   : > { %v4000_v2 = vshrl.u32 %v126_v0, 7  ;;  %v3968_v57 = vmov 1326507024   ;;  %s5777_s20 = smov (!%p121_p3, %s5470_s20), 31 }
   0xf   : > { %s3677_s22 = sshll.u32 %s5777_s20, 3 }
  0x10   : > { %v145_v3 = vadd.s32 %v3998_v1, %v4000_v2  ;;  %v129_v4 = vadd.s32 16, %v4000_v2  ;;  %v130_v5 = vadd.s32 24, %v4000_v2  ;;  %v128_v18 = vadd.s32 8, %v4000_v2  ;;  %s5531_s25 = scalar_lea.vmem %s5747_s2, %s3677_s22 }
  0x11   : > { %v4037_v37 = vadd.s32 40, %v4000_v2 }
  0x12   : > { %v161_v7 = vcvt.s32.f32 %v145_v3  ;;  %v147_v8 = vadd.s32 %v3998_v1, %v129_v4  ;;  %v148_v9 = vadd.s32 %v3998_v1, %v130_v5  ;;  %v4033_v27 = vadd.s32 %v3998_v1, %v128_v18 }
  0x14   : > { %v4014_v10 = vmul.f32 %v4009_v6, %v161_v7  ;;  %v163_v11 = vcvt.s32.f32 %v147_v8  ;;  %v164_v12 = vcvt.s32.f32 %v148_v9  ;;  %v162_v36 = vcvt.s32.f32 %v4033_v27 }
  0x16   : > { %v201_v13 = vand.u32 2147483647, %v4014_v10  ;;  %v204_v14 = vand.u32 2139095040, %v4014_v10  ;;  %v4019_v15 = vmul.f32 %v4009_v6, %v163_v11  ;;  %v4022_v16 = vmul.f32 %v4009_v6, %v164_v12 }
  0x17   : > { %vm203_vm13 = vcmp.lt.s32.totalorder %v4014_v10, 0 }
  0x18   : > { %v205_v17 = vshrl.u32 %v204_v14, 23  ;;  %v208_v19 = vand.u32 8388607, %v201_v13  ;;  %v409_v20 = vand.u32 2147483647, %v4019_v15  ;;  %v412_v21 = vand.u32 2139095040, %v4019_v15 }
  0x19   : > { %v516_v25 = vand.u32 2139095040, %v4022_v16 }
  0x1a   : > { %v3680_v22 = vadd.s32 4294967169, %v205_v17  ;;  %v413_v23 = vshrl.u32 %v412_v21, 23  ;;  %v416_v24 = vand.u32 8388607, %v409_v20  ;;  %v209_v28 = vor.u32 8388608, %v208_v19 }
  0x1b   : > { %v517_v31 = vshrl.u32 %v516_v25, 23 }
  0x1c   : > { %v211_v26 = vadd.s32 1, %v3680_v22  ;;  %v3688_v29 = vadd.s32 4294967169, %v413_v23  ;;  %v417_v30 = vor.u32 8388608, %v416_v24  ;;  %v4039_v38 = vshll.u32 %v209_v28, 8 }
  0x1d   : > { %v4043_v40 = vadd.s32 4294967169, %v517_v31 }
  0x1e   : > { %vm212_vm0 = vcmp.gt.s32.totalorder %v211_v26, 0  ;;  %v419_v33 = vadd.s32 1, %v3688_v29  ;;  %v4041_v39 = vshll.u32 %v417_v30, 8 }
  0x1f   : > { %v213_v32 = vsel %vm212_vm0, %v211_v26, 0 }
  0x20   : > { %v214_v34 = vshrl.u32 %v213_v32, 5  ;;  %v215_v35 = vand.u32 31, %v213_v32  ;;  %vm420_vm1 = vcmp.gt.s32.totalorder %v419_v33, 0 }
  0x21   : > { %v421_v62 = vsel %vm420_vm1, %v419_v33, 0  ;;  %vm4171_vm1 = vcmp.le.f32.partialorder %v201_v13, 0.7853982 }
  0x22   : > { %v216_v41 = vsub.s32 32, %v215_v35  ;;  %v218_v43 = vshll.u32 %v3963_v42, %v215_v35  ;;  %v221_v45 = vshll.u32 %v3964_v44, %v215_v35  ;;  %v224_v47 = vshll.u32 %v3965_v46, %v215_v35 }
  0x23   : > { %v227_v49 = vshll.u32 %v3966_v48, %v215_v35  ;;  %v230_v51 = vshll.u32 %v3967_v50, %v215_v35  ;;  %vm233_vm2 = vcmp.lt.s32.totalorder %v214_v34, 1  ;;  %vm234_vm3 = vcmp.lt.s32.totalorder %v214_v34, 2 }
  0x24   : > { %v217_v52 = vshrl.u32 %v3963_v42, %v216_v41  ;;  %v219_v53 = vshrl.u32 %v3964_v44, %v216_v41  ;;  %v222_v54 = vshrl.u32 %v3965_v46, %v216_v41  ;;  %v225_v55 = vshrl.u32 %v3966_v48, %v216_v41 }
  0x25   : > { %v228_v56 = vshrl.u32 %v3967_v50, %v216_v41  ;;  %v231_v58 = vshrl.u32 %v3968_v57, %v216_v41  ;;  %vm235_vm4 = vcmp.lt.s32.totalorder %v214_v34, 3  ;;  %vm236_vm5 = vcmp.lt.s32.totalorder %v214_v34, 4 }
  0x26   : > { %v220_v59 = vor.u32 %v219_v53, %v218_v43  ;;  %v223_v60 = vor.u32 %v222_v54, %v221_v45  ;;  %v226_v61 = vor.u32 %v225_v55, %v224_v47  ;;  %v422_v3 = vshrl.u32 %v421_v62, 5 }
  0x27   : > { %v229_v63 = vor.u32 %v228_v56, %v227_v49  ;;  %v232_v0 = vor.u32 %v231_v58, %v230_v51  ;;  %v423_v4 = vand.u32 31, %v421_v62  ;;  %v523_v54 = vadd.s32 1, %v4043_v40 }
  0x28   : > { %v237_v5 = vsel %vm233_vm2, %v217_v52, %v220_v59  ;;  %v238_v7 = vsel %vm236_vm5, %v226_v61, 2102212464  ;;  %v241_v8 = vsel %vm233_vm2, %v220_v59, %v223_v60  ;;  %v245_v9 = vsel %vm233_vm2, %v223_v60, %v226_v61 }
  0x29   : > { %v239_v11 = vsel %vm235_vm4, %v223_v60, %v238_v7  ;;  %v242_v12 = vsel %vm236_vm5, %v229_v63, 920167782  ;;  %v246_v14 = vsel %vm236_vm5, %v232_v0, 1326507024  ;;  %v424_v17 = vsub.s32 32, %v423_v4 }
  0x2a   : > { %v240_v18 = vsel %vm234_vm3, %v237_v5, %v239_v11  ;;  %v243_v19 = vsel %vm235_vm4, %v226_v61, %v242_v12  ;;  %v247_v21 = vsel %vm235_vm4, %v229_v63, %v246_v14  ;;  %v426_v22 = vshll.u32 %v3963_v42, %v423_v4 }
  0x2b   : > { %v244_v23 = vsel %vm234_vm3, %v241_v8, %v243_v19  ;;  %v248_v24 = vsel %vm234_vm3, %v245_v9, %v247_v21  ;;  %v256_v25 = vmul.u32 %v4039_v38, %v240_v18  ;;  %v425_v26 = vshrl.u32 %v3963_v42, %v424_v17 }
  0x2c   : > { %v4070_v28 = vmul.u32.u64.low %v4039_v38, %v248_v24  ;;  %v4071_v29 = vmul.u32.u64.high %v4039_v38, %v248_v24, %v4070_v28  ;;  %v4074_v30 = vmul.u32.u64.low %v4039_v38, %v244_v23  ;;  %v4075_v31 = vmul.u32.u64.high %v4039_v38, %v244_v23, %v4074_v30 }
  0x2d   : > { %v427_v32 = vshrl.u32 %v3964_v44, %v424_v17  ;;  %v429_v33 = vshll.u32 %v3964_v44, %v423_v4  ;;  %v430_v34 = vshrl.u32 %v3965_v46, %v424_v17  ;;  %v432_v35 = vshll.u32 %v3965_v46, %v423_v4 }
  0x2e   : > { %v433_v41 = vshrl.u32 %v3966_v48, %v424_v17  ;;  %v435_v43 = vshll.u32 %v3966_v48, %v423_v4  ;;  %v436_v45 = vshrl.u32 %v3967_v50, %v424_v17  ;;  %v438_v47 = vshll.u32 %v3967_v50, %v423_v4 }
  0x2f   : > { %v428_v49 = vor.u32 %v427_v32, %v426_v22  ;;  %v431_v38 = vor.u32 %v430_v34, %v429_v33  ;;  %v439_v51 = vshrl.u32 %v3968_v57, %v424_v17  ;;  %vm441_vm6 = vcmp.lt.s32.totalorder %v422_v3, 1 }
  0x30   : > { %vm258_vm7 = vc.u32 %v4071_v29, %v4074_v30  ;;  %v259_v52 = vadd.s32 1, %v4075_v31  ;;  %v434_v53 = vor.u32 %v433_v41, %v432_v35  ;;  %v437_v55 = vor.u32 %v436_v45, %v435_v43 }
  0x31   : > { %v440_v56 = vor.u32 %v439_v51, %v438_v47  ;;  %vm442_vm8 = vcmp.lt.s32.totalorder %v422_v3, 2  ;;  %vm443_vm9 = vcmp.lt.s32.totalorder %v422_v3, 3  ;;  %vm444_vm10 = vcmp.lt.s32.totalorder %v422_v3, 4 }
  0x32   : > { %v260_v58 = vsel %vm258_vm7, %v259_v52, %v4075_v31  ;;  %v445_v59 = vsel %vm441_vm6, %v425_v26, %v428_v49  ;;  %v449_v60 = vsel %vm441_vm6, %v428_v49, %v431_v38  ;;  %v446_v62 = vsel %vm444_vm10, %v434_v53, 2102212464 }
  0x33   : > { %v261_v61 = vadd.s32 %v260_v58, %v256_v25  ;;  %v450_v63 = vsel %vm444_vm10, %v437_v55, 920167782  ;;  %v453_v0 = vsel %vm441_vm6, %v431_v38, %v434_v53  ;;  %v447_v4 = vsel %vm443_vm9, %v431_v38, %v446_v62 }
  0x34   : > { %v451_v5 = vsel %vm443_vm9, %v434_v53, %v450_v63  ;;  %v454_v7 = vsel %vm444_vm10, %v440_v56, 1326507024  ;;  %vm524_vm11 = vcmp.gt.s32.totalorder %v523_v54, 0  ;;  %v513_v11 = vand.u32 2147483647, %v4022_v16 }
  0x35   : > { %v262_v40 = vadd.s32 536870912, %v261_v61  ;;  %v452_v8 = vsel %vm442_vm8, %v449_v60, %v451_v5  ;;  %v455_v9 = vsel %vm443_vm9, %v437_v55, %v454_v7  ;;  %v448_v12 = vsel %vm442_vm8, %v445_v59, %v447_v4 }
  0x36   : > { %v456_v14 = vsel %vm442_vm8, %v453_v0, %v455_v9  ;;  %v4100_v17 = vmul.u32.u64.low %v4041_v39, %v452_v8  ;;  %v4101_v18 = vmul.u32.u64.high %v4041_v39, %v452_v8, %v4100_v17  ;;  %v525_v23 = vsel %vm524_vm11, %v523_v54, 0 }
  0x37   : > { %v4104_v19 = vshrl.u32 %v262_v40, 30  ;;  %v4107_v21 = vmul.u32.u64.low %v4041_v39, %v456_v14  ;;  %v4108_v22 = vmul.u32.u64.high %v4041_v39, %v456_v14, %v4107_v21  ;;  %v527_v24 = vand.u32 31, %v525_v23 }
  0x38   : > { %v464_v26 = vmul.u32 %v4041_v39, %v448_v12  ;;  %v467_v3 = vadd.s32 1, %v4101_v18  ;;  %v520_v28 = vand.u32 8388607, %v513_v11  ;;  %v150_v31 = vadd.s32 %v3998_v1, %v4037_v37 }
  0x39   : > { %v264_v25 = vshll.u32 %v4104_v19, 30  ;;  %v131_v32 = vadd.s32 32, %v4000_v2  ;;  %vm466_vm12 = vc.u32 %v4108_v22, %v4100_v17  ;;  %v4123_v34 = vmul.f32 %v4009_v6, %v162_v36 }
  0x3a   : > { %v134_v39 = vadd.s32 56, %v4000_v2  ;;  %v468_v35 = vsel %vm466_vm12, %v467_v3, %v4101_v18  ;;  %v528_v41 = vsub.s32 32, %v527_v24  ;;  %v521_v47 = vor.u32 8388608, %v520_v28 }
  0x3b   : > { %v265_v33 = vsub.s32 %v261_v61, %v264_v25  ;;  %v469_v45 = vadd.s32 %v468_v35, %v464_v26  ;;  %v305_v37 = vand.u32 2147483647, %v4123_v34  ;;  %v166_v49 = vcvt.s32.f32 %v150_v31 }
  0x3c   : > { %v308_v51 = vand.u32 2139095040, %v4123_v34  ;;  %v4130_v52 = vadd.s32 %v3998_v1, %v131_v32  ;;  %v4133_v27 = vadd.s32 %v3998_v1, %v134_v39  ;;  %v530_v53 = vshll.u32 %v3963_v42, %v527_v24 }
  0x3d   : > { %v267_v43 = vsub.s32 0, %v265_v33  ;;  %v470_v36 = vadd.s32 536870912, %v469_v45  ;;  %v531_v54 = vshrl.u32 %v3964_v44, %v528_v41  ;;  %v533_v55 = vshll.u32 %v3964_v44, %v527_v24 }
  0x3e   : > { %v534_v58 = vshrl.u32 %v3965_v46, %v528_v41  ;;  %v536_v59 = vshll.u32 %v3965_v46, %v527_v24  ;;  %v537_v60 = vshrl.u32 %v3966_v48, %v528_v41  ;;  %v4144_v62 = vshll.u32 %v521_v47, 8 }
  0x3f   : > { %v3681_v38 = vmin.u32 %v267_v43, %v265_v33  ;;  %v4142_v61 = vshrl.u32 %v470_v36, 30  ;;  %v4148_v63 = vand.u32 8388607, %v305_v37  ;;  %v4151_v0 = vmul.f32 %v4009_v6, %v166_v49 }
  0x40   : > { %v257_v4 = vadd.s32 %v4074_v30, %v4071_v29  ;;  %v539_v7 = vshll.u32 %v3966_v48, %v527_v24  ;;  %v540_v40 = vshrl.u32 %v3967_v50, %v528_v41  ;;  %v287_v8 = vsub.s32 4, %v4104_v19 }
  0x41   : > { %v269_v56 = vclz %v3681_v38  ;;  %v472_v9 = vshll.u32 %v4142_v61, 30  ;;  %v526_v12 = vshrl.u32 %v525_v23, 5  ;;  %v309_v14 = vshrl.u32 %v308_v51, 23 }
  0x42   : > { %v532_v18 = vor.u32 %v531_v54, %v530_v53  ;;  %v535_v21 = vor.u32 %v534_v58, %v533_v55  ;;  %v538_v25 = vor.u32 %v537_v60, %v536_v59  ;;  %v542_v29 = vshll.u32 %v3967_v50, %v527_v24 }
  0x43   : > { %v3682_v5 = vadd.s32 4294967294, %v269_v56  ;;  %v4159_v3 = vsub.s32 %v469_v45, %v472_v9  ;;  %v543_v30 = vshrl.u32 %v3968_v57, %v528_v41  ;;  %v541_v39 = vor.u32 %v540_v40, %v539_v7 }
  0x44   : > { %v529_v23 = vshrl.u32 %v3963_v42, %v528_v41  ;;  %vm545_vm15 = vcmp.lt.s32.totalorder %v526_v12, 1  ;;  %vm548_vm0 = vcmp.lt.s32.totalorder %v526_v12, 4  ;;  %v288_v45 = vsel %vm203_vm13, %v287_v8, %v4104_v19 }
  0x45   : > { %vm3683_vm14 = vcmp.lt.s32.totalorder %v3682_v5, 0  ;;  %v475_v35 = vsub.s32 0, %v4159_v3  ;;  %v550_v24 = vsel %vm548_vm0, %v538_v25, 2102212464  ;;  %v544_v38 = vor.u32 %v543_v30, %v542_v29 }
  0x46   : > { %v272_v26 = vsel %vm3683_vm14, 0, %v3682_v5  ;;  %vm546_vm2 = vcmp.lt.s32.totalorder %v526_v12, 2  ;;  %vm547_vm3 = vcmp.lt.s32.totalorder %v526_v12, 3  ;;  %v553_v36 = vsel %vm545_vm15, %v532_v18, %v535_v21 }
  0x47   : > { %v273_v28 = vsub.s32 32, %v272_v26  ;;  %v274_v31 = vshll.u32 %v265_v33, %v272_v26  ;;  %v277_v32 = vsub.s32 4294967266, %v272_v26  ;;  %v3689_v49 = vmin.u32 %v475_v35, %v4159_v3 }
  0x48   : > { %v554_v53 = vsel %vm548_vm0, %v541_v39, 920167782  ;;  %vm411_vm4 = vcmp.lt.s32.totalorder %v4019_v15, 0  ;;  %v465_v19 = vadd.s32 %v4100_v17, %v4108_v22  ;;  %v549_v54 = vsel %vm545_vm15, %v529_v23, %v532_v18 }
  0x49   : > { %v275_v43 = vshrl.u32 %v257_v4, %v273_v28  ;;  %v278_v47 = vadd.s32 127, %v277_v32  ;;  %v477_v13 = vclz %v3689_v49  ;;  %v551_v55 = vsel %vm547_vm3, %v535_v21, %v550_v24 }
  0x4a   : > { %v555_v59 = vsel %vm547_vm3, %v538_v25, %v554_v53  ;;  %v557_v60 = vsel %vm545_vm15, %v535_v21, %v538_v25  ;;  %v495_v5 = vsub.s32 4, %v4142_v61  ;;  %v558_v40 = vsel %vm548_vm0, %v544_v38, 1326507024 }
  0x4b   : > { %v276_v41 = vor.u32 %v275_v43, %v274_v31  ;;  %v279_v51 = vshll.u32 %v278_v47, 23  ;;  %v3690_v4 = vadd.s32 4294967294, %v477_v13  ;;  %v556_v7 = vsel %vm546_vm2, %v553_v36, %v555_v59 }
  0x4c   : > { %v559_v17 = vsel %vm547_vm3, %v541_v39, %v558_v40  ;;  %v4190_v22 = vmul.u32.u64.low %v4144_v62, %v556_v7  ;;  %v4191_v9 = vmul.u32.u64.high %v4144_v62, %v556_v7, %v4190_v22  ;;  %vm4196_vm5 = vcmp.le.f32.partialorder %v409_v20, 0.7853982 }
  0x4d   : > { %v280_v56 = vor.u32 4788187, %v279_v51  ;;  %v283_v58 = vcvt.s32.f32 %v276_v41  ;;  %vm3691_vm6 = vcmp.lt.s32.totalorder %v3690_v4, 0  ;;  %v552_v21 = vsel %vm546_vm2, %v549_v54, %v551_v55 }
  0x4e   : > { %v560_v25 = vsel %vm546_vm2, %v557_v60, %v559_v17  ;;  %v3684_v26 = vadd.s32 4294967169, %v309_v14  ;;  %v480_v30 = vsel %vm3691_vm6, 0, %v3690_v4  ;;  %v290_v43 = vsel %vm4171_vm1, 0, %v288_v45 }
  0x4f   : > { %v281_v8 = vand.u32 2147483647, %v280_v56  ;;  %v4203_v28 = vmul.u32.u64.low %v4144_v62, %v560_v25  ;;  %v4204_v31 = vmul.u32.u64.high %v4144_v62, %v560_v25, %v4203_v28  ;;  %v481_v32 = vsub.s32 32, %v480_v30 }
  0x50   : > { %v482_v39 = vshll.u32 %v4159_v3, %v480_v30  ;;  %v485_v35 = vsub.s32 4294967266, %v480_v30  ;;  %v315_v20 = vadd.s32 1, %v3684_v26  ;;  %v568_v47 = vmul.u32 %v4144_v62, %v552_v21 }
  0x51   : > { %v284_v29 = vmul.f32 %v283_v58, %v281_v8  ;;  %v571_v12 = vadd.s32 1, %v4191_v9  ;;  %v294_v14 = vadd.s32 3, %v290_v43  ;;  %v483_v24 = vshrl.u32 %v465_v19, %v481_v32 }
  0x52   : > { %v486_v49 = vadd.s32 127, %v485_v35  ;;  %vm316_vm7 = vcmp.gt.s32.totalorder %v315_v20, 0  ;;  %v496_v3 = vsel %vm411_vm4, %v495_v5, %v4142_v61  ;;  %vm570_vm8 = vc.u32 %v4204_v31, %v4190_v22 }
  0x53   : > { %v285_v23 = vxor.u32 2147483648, %v284_v29  ;;  %v317_v41 = vsel %vm316_vm7, %v315_v20, 0  ;;  %v484_v45 = vor.u32 %v483_v24, %v482_v39  ;;  %v572_v36 = vsel %vm570_vm8, %v571_v12, %v4191_v9 }
  0x54   : > { %v487_v51 = vshll.u32 %v486_v49, 23  ;;  %v573_v53 = vadd.s32 %v572_v36, %v568_v47  ;;  %v313_v19 = vor.u32 8388608, %v4148_v63  ;;  %v319_v13 = vand.u32 31, %v317_v41 }
  0x55   : > { %v286_v38 = vsel %vm203_vm13, %v285_v23, %v284_v29  ;;  %v4223_v54 = vand.u32 3, %v290_v43  ;;  %v491_v55 = vcvt.s32.f32 %v484_v45  ;;  %v4225_v56 = vand.u32 3, %v294_v14 }
  0x56   : > { %v289_v62 = vsel %vm4171_vm1, %v4014_v10, %v286_v38  ;;  %v488_v61 = vor.u32 4788187, %v487_v51  ;;  %v498_v33 = vsel %vm4196_vm5, 0, %v496_v3  ;;  %v574_v58 = vadd.s32 536870912, %v573_v53 }
  0x57   : > { %3889 = vcosq.f32 %v289_v62  ;;  %v320_v59 = vsub.s32 32, %v319_v13  ;;  %v502_v4 = vadd.s32 3, %v498_v33  ;;  %v322_v5 = vshll.u32 %v3963_v42, %v319_v13 }
  0x58   : > { %3891 = vsinq.f32 %v289_v62  ;;  %v489_v60 = vand.u32 2147483647, %v488_v61  ;;  %v325_v7 = vshll.u32 %v3964_v44, %v319_v13  ;;  %v4231_v63 = vshrl.u32 %v574_v58, 30 }
  0x59   : > { %v323_v40 = vshrl.u32 %v3964_v44, %v320_v59  ;;  %v328_v8 = vshll.u32 %v3965_v46, %v319_v13  ;;  %v331_v17 = vshll.u32 %v3966_v48, %v319_v13  ;;  %vm1963_vm9 = vcmp.eq.s32.totalorder %v4223_v54, 2 }
  0x5a   : > { %v492_v9 = vmul.f32 %v491_v55, %v489_v60  ;;  %v326_v21 = vshrl.u32 %v3965_v46, %v320_v59  ;;  %v329_v25 = vshrl.u32 %v3966_v48, %v320_v59  ;;  %v332_v26 = vshrl.u32 %v3967_v50, %v320_v59 }
  0x5b   : > { %vm297_vm10 = vcmp.eq.s32.totalorder %v4225_v56, 0  ;;  %vm300_vm11 = vcmp.eq.s32.totalorder %v4225_v56, 2  ;;  %vm1960_vm12 = vcmp.eq.s32.totalorder %v4223_v54, 0  ;;  %v576_v29 = vshll.u32 %v4231_v63, 30 }
  0x5c   : > { %v4244_v30 = vshrl.u32 %v317_v41, 5  ;;  %vm296_vm13 = vcmp.lt.s32.totalorder %v4225_v56, 2  ;;  %vm1959_vm14 = vcmp.lt.s32.totalorder %v4223_v54, 2  ;;  %v493_v28 = vxor.u32 2147483648, %v492_v9 }
  0x5d   : > { %v4248_v32 = vand.u32 3, %v502_v4  ;;  %v4250_v39 = vand.u32 3, %v498_v33  ;;  %v724_v35 = vand.u32 2139095040, %v4151_v0  ;;  %vm293_vm15 = vweird.f32 %v4014_v10 }
  0x5e   : > { %v4254_v20 = vsub.s32 %v573_v53, %v576_v29  ;;  %v324_v23 = vor.u32 %v323_v40, %v322_v5  ;;  %v334_v43 = vshll.u32 %v3967_v50, %v319_v13  ;;  %v335_v47 = vshrl.u32 %v3968_v57, %v320_v59 }
  0x5f   : > { %v494_v12 = vsel %vm411_vm4, %v493_v28, %v492_v9  ;;  %v327_v14 = vor.u32 %v326_v21, %v325_v7  ;;  %v330_v24 = vor.u32 %v329_v25, %v328_v8  ;;  %v333_v49 = vor.u32 %v332_v26, %v331_v17 }
  0x60   : > { %v497_v38 = vsel %vm4196_vm5, %v4019_v15, %v494_v12  ;;  %v579_v3 = vsub.s32 0, %v4254_v20  ;;  %vm337_vm0 = vcmp.lt.s32.totalorder %v4244_v30, 1  ;;  %vm340_vm1 = vcmp.lt.s32.totalorder %v4244_v30, 4 }
  0x61   : > { %3893 = vcosq.f32 %v497_v38  ;;  %v569_v41 = vadd.s32 %v4190_v22, %v4204_v31  ;;  %v321_v62 = vshrl.u32 %v3963_v42, %v320_v59  ;;  %v4269_v45 = vshll.u32 %v313_v19, 8 }
  0x62   : > { %3895 = vsinq.f32 %v497_v38  ;;  %v3693_v51 = vmin.u32 %v579_v3, %v4254_v20  ;;  %vm339_vm2 = vcmp.lt.s32.totalorder %v4244_v30, 3  ;;  %v342_v18 = vsel %vm340_vm1, %v330_v24, 2102212464 }
  0x63   : > { %v336_v53 = vor.u32 %v335_v47, %v334_v43  ;;  %vm338_vm3 = vcmp.lt.s32.totalorder %v4244_v30, 2  ;;  %v345_v13 = vsel %vm337_vm0, %v324_v23, %v327_v14  ;;  %v346_v22 = vsel %vm340_vm1, %v333_v49, 920167782 }
  0x64   : > { %v3890_v36 = vpop.eup %3889  ;;  %v581_v61 = vclz %v3693_v51  ;;  %v599_v55 = vsub.s32 4, %v4231_v63  ;;  %v725_v33 = vshrl.u32 %v724_v35, 23  ;;  %v341_v59 = vsel %vm337_vm0, %v321_v62, %v324_v23 }
  0x65   : > { %v3892_v31 = vpop.eup %3891  ;;  %v301_v19 = vxor.u32 2147483648, %v3890_v36  ;;  %v343_v60 = vsel %vm339_vm2, %v327_v14, %v342_v18  ;;  %v347_v4 = vsel %vm339_vm2, %v330_v24, %v346_v22  ;;  %vm515_vm4 = vcmp.lt.s32.totalorder %v4022_v16, 0 }
  0x66   : > { %v298_v58 = vxor.u32 2147483648, %v3892_v31  ;;  %v3694_v40 = vadd.s32 4294967294, %v581_v61  ;;  %v348_v8 = vsel %vm338_vm3, %v345_v13, %v347_v4  ;;  %v349_v21 = vsel %vm337_vm0, %v327_v14, %v330_v24 }
  0x67   : > { %v1965_v5 = vsel %vm1963_vm9, %v301_v19, %v3892_v31  ;;  %v302_v7 = vsel %vm300_vm11, %v301_v19, %v3892_v31  ;;  %v350_v25 = vsel %vm340_vm1, %v336_v53, 1326507024  ;;  %vm2165_vm5 = vcmp.lt.s32.totalorder %v4250_v39, 2 }
  0x68   : > { %v1962_v17 = vsel %vm1960_vm12, %v3890_v36, %v298_v58  ;;  %v299_v9 = vsel %vm297_vm10, %v3890_v36, %v298_v58  ;;  %vm3695_vm6 = vcmp.lt.s32.totalorder %v3694_v40, 0  ;;  %v351_v28 = vsel %vm339_vm2, %v333_v49, %v350_v25 }
  0x69   : > { %v1966_v26 = vsel %vm1959_vm14, %v1962_v17, %v1965_v5  ;;  %v303_v29 = vsel %vm296_vm13, %v299_v9, %v302_v7  ;;  %vm501_vm7 = vweird.f32 %v4019_v15  ;;  %v584_v54 = vsel %vm3695_vm6, 0, %v3694_v40 }
  0x6a   : > { %v1967_v35 = vsel %vm293_vm15, nan, %v1966_v26  ;;  %v4313_v23 = vsel %vm293_vm15, nan, %v303_v29  ;;  %v352_v56 = vsel %vm338_vm3, %v349_v21, %v351_v28  ;;  %v585_v43 = vsub.s32 32, %v584_v54 }
  0x6b   : > { %3529 = vrot.lane.b32.xlu0 %v1967_v35, %s3969_s15  ;;  %v586_v47 = vshll.u32 %v4254_v20, %v584_v54  ;;  %v589_v12 = vsub.s32 4294967266, %v584_v54  ;;  %v344_v14 = vsel %vm338_vm3, %v341_v59, %v343_v60  ;;  %vm2166_vm8 = vcmp.eq.s32.totalorder %v4250_v39, 0 }
  0x6c   : > { %v4323_v10 = vmul.u32.u64.low %v4269_v45, %v352_v56  ;;  %v4324_v24 = vmul.u32.u64.high %v4269_v45, %v352_v56, %v4323_v10  ;;  %v4327_v49 = vmul.u32.u64.low %v4269_v45, %v348_v8  ;;  %v4328_v38 = vmul.u32.u64.high %v4269_v45, %v348_v8, %v4327_v49 }
  0x6d   : > { %v587_v3 = vshrl.u32 %v569_v41, %v585_v43  ;;  %v590_v62 = vadd.s32 127, %v589_v12  ;;  %v3700_v51 = vadd.s32 4294967169, %v725_v33  ;;  %vm504_vm9 = vcmp.lt.s32.totalorder %v4248_v32, 2 }
  0x6e   : > { %vm505_vm10 = vcmp.eq.s32.totalorder %v4248_v32, 0  ;;  %vm508_vm11 = vcmp.eq.s32.totalorder %v4248_v32, 2  ;;  %vm2169_vm12 = vcmp.eq.s32.totalorder %v4250_v39, 2  ;;  %v3894_v30 = vpop.eup %3893  ;;  %v360_v36 = vmul.u32 %v4269_v45, %v344_v14 }
  0x6f   : > { %v588_v20 = vor.u32 %v587_v3, %v586_v47  ;;  %v591_v18 = vshll.u32 %v590_v62, 23  ;;  %v731_v53 = vadd.s32 1, %v3700_v51  ;;  %v3896_v13 = vpop.eup %3895  ;;  %v509_v22 = vxor.u32 2147483648, %v3894_v30 }
  0x70   : > { %v600_v41 = vsel %vm515_vm4, %v599_v55, %v4231_v63  ;;  %vm362_vm13 = vc.u32 %v4324_v24, %v4327_v49  ;;  %v363_v31 = vadd.s32 1, %v4328_v38  ;;  %v506_v19 = vxor.u32 2147483648, %v3896_v13 }
  0x71   : > { %v592_v61 = vor.u32 4788187, %v591_v18  ;;  %v595_v33 = vcvt.s32.f32 %v588_v20  ;;  %vm732_vm14 = vcmp.gt.s32.totalorder %v731_v53, 0  ;;  %v2171_v58 = vsel %vm2169_vm12, %v509_v22, %v3896_v13 }
  0x72   : > { %v510_v45 = vsel %vm508_vm11, %v509_v22, %v3896_v13  ;;  %v364_v59 = vsel %vm362_vm13, %v363_v31, %v4328_v38  ;;  %v733_v60 = vsel %vm732_vm14, %v731_v53, 0  ;;  %v2168_v63 = vsel %vm2166_vm8, %v3894_v30, %v506_v19 }
  0x73   : > { %v507_v55 = vsel %vm505_vm10, %v3894_v30, %v506_v19  ;;  %v593_v4 = vand.u32 2147483647, %v592_v61  ;;  %v365_v5 = vadd.s32 %v364_v59, %v360_v36  ;;  %v2172_v7 = vsel %vm2165_vm5, %v2168_v63, %v2171_v58 }
  0x74   : > { %v511_v40 = vsel %vm504_vm9, %v507_v55, %v510_v45  ;;  %vm4358_vm15 = vcmp.le.f32.partialorder %v513_v11, 0.7853982  ;;  %v735_v17 = vand.u32 31, %v733_v60  ;;  %v2173_v9 = vsel %vm501_vm7, nan, %v2172_v7 }
  0x75   : > { %v4366_v21 = vsel %vm501_vm7, nan, %v511_v40  ;;  %v596_v25 = vmul.f32 %v595_v33, %v593_v4  ;;  %v366_v39 = vadd.s32 536870912, %v365_v5  ;;  %3533 = vrot.lane.b32.xlu1 %v2173_v9, %s3969_s15  ;;  %v602_v32 = vsel %vm4358_vm15, 0, %v600_v41 }
  0x76   : > { %v721_v11 = vand.u32 2147483647, %v4151_v0  ;;  %v736_v26 = vsub.s32 32, %v735_v17  ;;  %v165_v29 = vcvt.s32.f32 %v4130_v52  ;;  %v606_v35 = vadd.s32 3, %v602_v32 }
  0x77   : > { %v597_v28 = vxor.u32 2147483648, %v596_v25  ;;  %v4373_v54 = vshrl.u32 %v366_v39, 30  ;;  %v4375_v56 = vshrl.u32 %v733_v60, 5  ;;  %v738_v15 = vshll.u32 %v3963_v42, %v735_v17 }
  0x78   : > { %v741_v43 = vshll.u32 %v3964_v44, %v735_v17  ;;  %v744_v47 = vshll.u32 %v3965_v46, %v735_v17  ;;  %v747_v12 = vshll.u32 %v3966_v48, %v735_v17  ;;  %v739_v52 = vshrl.u32 %v3964_v44, %v736_v26 }
  0x79   : > { %v598_v14 = vsel %vm515_vm4, %v597_v28, %v596_v25  ;;  %v368_v10 = vshll.u32 %v4373_v54, 30  ;;  %v748_v38 = vshrl.u32 %v3967_v50, %v736_v26  ;;  %v742_v62 = vshrl.u32 %v3965_v46, %v736_v26 }
  0x7a   : > { %v601_v3 = vsel %vm4358_vm15, %v4022_v16, %v598_v14  ;;  %v745_v51 = vshrl.u32 %v3966_v48, %v736_v26  ;;  %v750_v30 = vshll.u32 %v3967_v50, %v735_v17  ;;  %v4395_v18 = vmul.f32 %v4009_v6, %v165_v29 }
  0x7b   : > { %3897 = vcosq.f32 %v601_v3  ;;  %v4392_v20 = vsub.s32 %v365_v5, %v368_v10  ;;  %v168_v36 = vcvt.s32.f32 %v4133_v27  ;;  %v728_v53 = vand.u32 8388607, %v721_v11 }
  0x7c   : > { %3899 = vsinq.f32 %v601_v3  ;;  %v749_v13 = vor.u32 %v748_v38, %v747_v12  ;;  %v751_v22 = vshrl.u32 %v3968_v57, %v736_v26  ;;  %v4401_v41 = vand.u32 3, %v606_v35 }
  0x7d   : > { %v4403_v31 = vand.u32 3, %v602_v32  ;;  %v371_v19 = vsub.s32 0, %v4392_v20  ;;  %v740_v61 = vor.u32 %v739_v52, %v738_v15  ;;  %v743_v33 = vor.u32 %v742_v62, %v741_v43 }
  0x7e   : > { %v746_v58 = vor.u32 %v745_v51, %v744_v47  ;;  %v752_v45 = vor.u32 %v751_v22, %v750_v30  ;;  %vm756_vm0 = vcmp.lt.s32.totalorder %v4375_v56, 4  ;;  %v737_v60 = vshrl.u32 %v3963_v42, %v736_v26 }
  0x7f   : > { %v3685_v59 = vmin.u32 %v371_v19, %v4392_v20  ;;  %vm753_vm1 = vcmp.lt.s32.totalorder %v4375_v56, 1  ;;  %vm755_vm2 = vcmp.lt.s32.totalorder %v4375_v56, 3  ;;  %v729_v63 = vor.u32 8388608, %v728_v53 }
  0x80   : > { %v758_v55 = vsel %vm756_vm0, %v746_v58, 2102212464  ;;  %v762_v4 = vsel %vm756_vm0, %v749_v13, 920167782  ;;  %v620_v5 = vand.u32 2139095040, %v4395_v18  ;;  %vm2269_vm3 = vcmp.eq.s32.totalorder %v4403_v31, 0 }
  0x81   : > { %vm2272_vm4 = vcmp.eq.s32.totalorder %v4403_v31, 2  ;;  %v373_v7 = vclz %v3685_v59  ;;  %vm754_vm5 = vcmp.lt.s32.totalorder %v4375_v56, 2  ;;  %vm2268_vm6 = vcmp.lt.s32.totalorder %v4403_v31, 2 }
  0x82   : > { %v761_v40 = vsel %vm753_vm1, %v740_v61, %v743_v33  ;;  %v763_v8 = vsel %vm755_vm2, %v746_v58, %v762_v4  ;;  %v765_v17 = vsel %vm753_vm1, %v743_v33, %v746_v58  ;;  %v766_v9 = vsel %vm756_vm0, %v752_v45, 1326507024 }
  0x83   : > { %vm605_vm7 = vweird.f32 %v4022_v16  ;;  %v3686_v25 = vadd.s32 4294967294, %v373_v7  ;;  %v757_v39 = vsel %vm753_vm1, %v737_v60, %v740_v61  ;;  %v759_v32 = vsel %vm755_vm2, %v743_v33, %v758_v55 }
  0x84   : > { %v767_v26 = vsel %vm755_vm2, %v749_v13, %v766_v9  ;;  %vm608_vm8 = vcmp.lt.s32.totalorder %v4401_v41, 2  ;;  %v769_v28 = vshll.u32 %v729_v63, 8  ;;  %v621_v35 = vshrl.u32 %v620_v5, 23 }
  0x85   : > { %v768_v29 = vsel %vm754_vm5, %v765_v17, %v767_v26  ;;  %vm609_vm9 = vcmp.eq.s32.totalorder %v4401_v41, 0  ;;  %v361_v15 = vadd.s32 %v4327_v49, %v4324_v24  ;;  %vm3687_vm10 = vcmp.lt.s32.totalorder %v3686_v25, 0 }
  0x86   : > { %v764_v43 = vsel %vm754_vm5, %v761_v40, %v763_v8  ;;  %vm307_vm11 = vcmp.lt.s32.totalorder %v4123_v34, 0  ;;  %v376_v47 = vsel %vm3687_vm10, 0, %v3686_v25  ;;  %v760_v12 = vsel %vm754_vm5, %v757_v39, %v759_v32 }
  0x87   : > { %v4446_v14 = vmul.u32.u64.low %v769_v28, %v768_v29  ;;  %v4447_v10 = vmul.u32.u64.high %v769_v28, %v768_v29, %v4446_v14  ;;  %v377_v52 = vsub.s32 32, %v376_v47  ;;  %v378_v38 = vshll.u32 %v4392_v20, %v376_v47 }
  0x88   : > { %v381_v3 = vsub.s32 4294967266, %v376_v47  ;;  %v3696_v62 = vadd.s32 4294967169, %v621_v35  ;;  %v3898_v51 = vpop.eup %3897  ;;  %vm612_vm12 = vcmp.eq.s32.totalorder %v4401_v41, 2  ;;  %v617_v30 = vand.u32 2147483647, %v4395_v18 }
  0x89   : > { %v4451_v24 = vmul.u32.u64.low %v769_v28, %v764_v43  ;;  %v4452_v49 = vmul.u32.u64.high %v769_v28, %v764_v43, %v4451_v24  ;;  %v3900_v53 = vpop.eup %3899  ;;  %v613_v56 = vxor.u32 2147483648, %v3898_v51  ;;  %v379_v13 = vshrl.u32 %v361_v15, %v377_v52 }
  0x8a   : > { %v382_v22 = vadd.s32 127, %v381_v3  ;;  %v627_v19 = vadd.s32 1, %v3696_v62  ;;  %v610_v61 = vxor.u32 2147483648, %v3900_v53  ;;  %v391_v33 = vsub.s32 4, %v4373_v54 }
  0x8b   : > { %v776_v20 = vmul.u32 %v769_v28, %v760_v12  ;;  %vm778_vm13 = vc.u32 %v4447_v10, %v4451_v24  ;;  %v614_v58 = vsel %vm612_vm12, %v613_v56, %v3900_v53  ;;  %v2274_v45 = vsel %vm2272_vm4, %v613_v56, %v3900_v53 }
  0x8c   : > { %v380_v59 = vor.u32 %v379_v13, %v378_v38  ;;  %v383_v60 = vshll.u32 %v382_v22, 23  ;;  %v611_v63 = vsel %vm609_vm9, %v3898_v51, %v610_v61  ;;  %v2271_v55 = vsel %vm2269_vm3, %v3898_v51, %v610_v61 }
  0x8d   : > { %v779_v4 = vadd.s32 1, %v4452_v49  ;;  %vm628_vm14 = vcmp.gt.s32.totalorder %v627_v19, 0  ;;  %v615_v5 = vsel %vm608_vm8, %v611_v63, %v614_v58  ;;  %v2275_v7 = vsel %vm2268_vm6, %v2271_v55, %v2274_v45 }
  0x8e   : > { %v384_v40 = vor.u32 4788187, %v383_v60  ;;  %v387_v8 = vcvt.s32.f32 %v380_v59  ;;  %v4472_v17 = vsel %vm605_vm7, nan, %v615_v5  ;;  %v2276_v9 = vsel %vm605_vm7, nan, %v2275_v7 }
  0x8f   : > { %v780_v25 = vsel %vm778_vm13, %v779_v4, %v4452_v49  ;;  %v629_v39 = vsel %vm628_vm14, %v627_v19, 0  ;;  %3535 = vrot.lane.b32.xlu1 %v2276_v9, %s3969_s15  ;;  %v392_v41 = vsel %vm307_vm11, %v391_v33, %v4373_v54  ;;  %vm4483_vm15 = vcmp.le.f32.partialorder %v305_v37, 0.7853982 }
  0x90   : > { %v385_v32 = vand.u32 2147483647, %v384_v40  ;;  %v781_v31 = vadd.s32 %v780_v25, %v776_v20  ;;  %v631_v26 = vand.u32 31, %v629_v39  ;;  %v394_v15 = vsel %vm4483_vm15, 0, %v392_v41 }
  0x91   : > { %v624_v43 = vand.u32 8388607, %v617_v30  ;;  %v4491_v47 = vshrl.u32 %v629_v39, 5  ;;  %v4496_v54 = vmul.f32 %v4009_v6, %v168_v36  ;;  %v398_v56 = vadd.s32 3, %v394_v15 }
  0x92   : > { %v388_v16 = vmul.f32 %v387_v8, %v385_v32  ;;  %v782_v28 = vadd.s32 536870912, %v781_v31  ;;  %v632_v35 = vsub.s32 32, %v631_v26  ;;  %v634_v14 = vshll.u32 %v3963_v42, %v631_v26 }
  0x93   : > { %v637_v52 = vshll.u32 %v3964_v44, %v631_v26  ;;  %v643_v62 = vshll.u32 %v3966_v48, %v631_v26  ;;  %v640_v36 = vshll.u32 %v3965_v46, %v631_v26  ;;  %v646_v13 = vshll.u32 %v3967_v50, %v631_v26 }
  0x94   : > { %v389_v37 = vxor.u32 2147483648, %v388_v16  ;;  %v4498_v12 = vshrl.u32 %v782_v28, 30  ;;  %v635_v38 = vshrl.u32 %v3964_v44, %v632_v35  ;;  %v638_v3 = vshrl.u32 %v3965_v46, %v632_v35 }
  0x95   : > { %v644_v51 = vshrl.u32 %v3967_v50, %v632_v35  ;;  %v641_v49 = vshrl.u32 %v3966_v48, %v632_v35  ;;  %v647_v22 = vshrl.u32 %v3968_v57, %v632_v35  ;;  %v625_v61 = vor.u32 8388608, %v624_v43 }
  0x96   : > { %v390_v27 = vsel %vm307_vm11, %v389_v37, %v388_v16  ;;  %v784_v6 = vshll.u32 %v4498_v12, 30  ;;  %v932_v33 = vand.u32 2139095040, %v4496_v54  ;;  %v636_v20 = vor.u32 %v635_v38, %v634_v14 }
  0x97   : > { %v393_v53 = vsel %vm4483_vm15, %v4123_v34, %v390_v27  ;;  %v639_v58 = vor.u32 %v638_v3, %v637_v52  ;;  %v645_v45 = vor.u32 %v644_v51, %v643_v62  ;;  %v4519_v59 = vand.u32 3, %v394_v15 }
  0x98   : > { %3901 = vcosq.f32 %v393_v53  ;;  %v4516_v19 = vsub.s32 %v781_v31, %v784_v6  ;;  %v642_v63 = vor.u32 %v641_v49, %v640_v36  ;;  %vm649_vm0 = vcmp.lt.s32.totalorder %v4491_v47, 1 }
  0x99   : > { %3903 = vsinq.f32 %v393_v53  ;;  %v4523_v55 = vand.u32 3, %v398_v56  ;;  %v648_v4 = vor.u32 %v647_v22, %v646_v13  ;;  %vm652_vm1 = vcmp.lt.s32.totalorder %v4491_v47, 4 }
  0x9a   : > { %v787_v60 = vsub.s32 0, %v4516_v19  ;;  %v633_v7 = vshrl.u32 %v3963_v42, %v632_v35  ;;  %vm651_vm2 = vcmp.lt.s32.totalorder %v4491_v47, 3  ;;  %v4529_v40 = vshll.u32 %v625_v61, 8 }
  0x9b   : > { %vm723_vm3 = vcmp.lt.s32.totalorder %v4151_v0, 0  ;;  %vm650_vm4 = vcmp.lt.s32.totalorder %v4491_v47, 2  ;;  %v657_v8 = vsel %vm649_vm0, %v636_v20, %v639_v58  ;;  %v658_v9 = vsel %vm652_vm1, %v645_v45, 920167782 }
  0x9c   : > { %v3701_v5 = vmin.u32 %v787_v60, %v4516_v19  ;;  %v933_v25 = vshrl.u32 %v932_v33, 23  ;;  %vm2063_vm5 = vcmp.eq.s32.totalorder %v4519_v59, 0  ;;  %vm2066_vm6 = vcmp.eq.s32.totalorder %v4519_v59, 2 }
  0x9d   : > { %v654_v32 = vsel %vm652_vm1, %v642_v63, 2102212464  ;;  %v661_v41 = vsel %vm649_vm0, %v639_v58, %v642_v63  ;;  %vm2062_vm7 = vcmp.lt.s32.totalorder %v4519_v59, 2  ;;  %v777_v31 = vadd.s32 %v4451_v24, %v4447_v10 }
  0x9e   : > { %v789_v39 = vclz %v3701_v5  ;;  %v659_v26 = vsel %vm651_vm2, %v642_v63, %v658_v9  ;;  %v662_v29 = vsel %vm652_vm1, %v648_v4, 1326507024  ;;  %v3708_v16 = vadd.s32 4294967169, %v933_v25 }
  0x9f   : > { %vm397_vm8 = vweird.f32 %v4123_v34  ;;  %vm4553_vm9 = vcmp.le.f32.partialorder %v721_v11, 0.7853982  ;;  %v653_v15 = vsel %vm649_vm0, %v633_v7, %v636_v20  ;;  %v660_v10 = vsel %vm650_vm4, %v657_v8, %v659_v26 }
  0xa0   : > { %v3702_v35 = vadd.s32 4294967294, %v789_v39  ;;  %v663_v24 = vsel %vm651_vm2, %v645_v45, %v662_v29  ;;  %v655_v43 = vsel %vm651_vm2, %v639_v58, %v654_v32  ;;  %v807_v52 = vsub.s32 4, %v4498_v12 }
  0xa1   : > { %v664_v37 = vsel %vm650_vm4, %v661_v41, %v663_v24  ;;  %v4568_v11 = vmul.u32.u64.low %v4529_v40, %v660_v10  ;;  %v4569_v14 = vmul.u32.u64.high %v4529_v40, %v660_v10, %v4568_v11  ;;  %vm400_vm11 = vcmp.lt.s32.totalorder %v4523_v55, 2 }
  0xa2   : > { %vm3703_vm10 = vcmp.lt.s32.totalorder %v3702_v35, 0  ;;  %v4574_v38 = vmul.u32.u64.low %v4529_v40, %v664_v37  ;;  %v4575_v3 = vmul.u32.u64.high %v4529_v40, %v664_v37, %v4574_v38  ;;  %vm401_vm12 = vcmp.eq.s32.totalorder %v4523_v55, 0 }
  0xa3   : > { %v792_v62 = vsel %vm3703_vm10, 0, %v3702_v35  ;;  %v939_v51 = vadd.s32 1, %v3708_v16  ;;  %v656_v49 = vsel %vm650_vm4, %v653_v15, %v655_v43  ;;  %vm404_vm13 = vcmp.eq.s32.totalorder %v4523_v55, 2 }
  0xa4   : > { %v793_v27 = vsub.s32 32, %v792_v62  ;;  %v794_v6 = vshll.u32 %v4516_v19, %v792_v62  ;;  %v797_v36 = vsub.s32 4294967266, %v792_v62  ;;  %v675_v56 = vadd.s32 1, %v4569_v14 }
  0xa5   : > { %v3902_v53 = vpop.eup %3901  ;;  %v929_v13 = vand.u32 2147483647, %v4496_v54  ;;  %vm940_vm14 = vcmp.gt.s32.totalorder %v939_v51, 0  ;;  %v808_v19 = vsel %vm723_vm3, %v807_v52, %v4498_v12  ;;  %v672_v47 = vmul.u32 %v4529_v40, %v656_v49 }
  0xa6   : > { %v3904_v22 = vpop.eup %3903  ;;  %v405_v61 = vxor.u32 2147483648, %v3902_v53  ;;  %v795_v33 = vshrl.u32 %v777_v31, %v793_v27  ;;  %v798_v20 = vadd.s32 127, %v797_v36  ;;  %vm674_vm15 = vc.u32 %v4575_v3, %v4568_v11 }
  0xa7   : > { %v402_v58 = vxor.u32 2147483648, %v3904_v22  ;;  %v941_v45 = vsel %vm940_vm14, %v939_v51, 0  ;;  %v810_v12 = vsel %vm4553_vm9, 0, %v808_v19  ;;  %v676_v40 = vsel %vm674_vm15, %v675_v56, %v4569_v14 }
  0xa8   : > { %v2068_v60 = vsel %vm2066_vm6, %v405_v61, %v3904_v22  ;;  %v406_v63 = vsel %vm404_vm13, %v405_v61, %v3904_v22  ;;  %v796_v4 = vor.u32 %v795_v33, %v794_v6  ;;  %v799_v5 = vshll.u32 %v798_v20, 23 }
  0xa9   : > { %v2065_v7 = vsel %vm2063_vm5, %v3902_v53, %v402_v58  ;;  %v403_v8 = vsel %vm401_vm12, %v3902_v53, %v402_v58  ;;  %v677_v26 = vadd.s32 %v676_v40, %v672_v47  ;;  %v943_v29 = vand.u32 31, %v941_v45 }
  0xaa   : > { %v2069_v9 = vsel %vm2062_vm7, %v2065_v7, %v2068_v60  ;;  %v407_v25 = vsel %vm400_vm11, %v403_v8, %v406_v63  ;;  %v800_v39 = vor.u32 4788187, %v799_v5  ;;  %v803_v32 = vcvt.s32.f32 %v796_v4 }
  0xab   : > { %v2070_v41 = vsel %vm397_vm8, nan, %v2069_v9  ;;  %v4608_v31 = vsel %vm397_vm8, nan, %v407_v25  ;;  %v814_v35 = vadd.s32 3, %v810_v12  ;;  %v936_v59 = vand.u32 8388607, %v929_v13 }
  0xac   : > { %3531 = vrot.lane.b32.xlu0 %v2070_v41, %s3969_s15  ;;  %v801_v16 = vand.u32 2147483647, %v800_v39  ;;  %v133_v55 = vadd.s32 48, %v4000_v2  ;;  %v678_v15 = vadd.s32 536870912, %v677_v26  ;;  %v942_v10 = vshrl.u32 %v941_v45, 5 }
  0xad   : > { %v944_v24 = vsub.s32 32, %v943_v29  ;;  %v946_v43 = vshll.u32 %v3963_v42, %v943_v29  ;;  %v949_v34 = vshll.u32 %v3964_v44, %v943_v29  ;;  %v952_v14 = vshll.u32 %v3965_v46, %v943_v29 }
  0xae   : > { %v804_v37 = vmul.f32 %v803_v32, %v801_v16  ;;  %v955_v52 = vshll.u32 %v3966_v48, %v943_v29  ;;  %v4618_v38 = vshrl.u32 %v678_v15, 30  ;;  %v958_v27 = vshll.u32 %v3967_v50, %v943_v29 }
  0xaf   : > { %v947_v62 = vshrl.u32 %v3964_v44, %v944_v24  ;;  %v950_v51 = vshrl.u32 %v3965_v46, %v944_v24  ;;  %v953_v36 = vshrl.u32 %v3966_v48, %v944_v24  ;;  %v956_v49 = vshrl.u32 %v3967_v50, %v944_v24 }
  0xb0   : > { %v805_v6 = vxor.u32 2147483648, %v804_v37  ;;  %v959_v53 = vshrl.u32 %v3968_v57, %v944_v24  ;;  %v680_v56 = vshll.u32 %v4618_v38, 30  ;;  %v937_v22 = vor.u32 8388608, %v936_v59 }
  0xb1   : > { %v945_v61 = vshrl.u32 %v3963_v42, %v944_v24  ;;  %v151_v33 = vadd.s32 %v3998_v1, %v133_v55  ;;  %v948_v19 = vor.u32 %v947_v62, %v946_v43  ;;  %v954_v58 = vor.u32 %v953_v36, %v952_v14 }
  0xb2   : > { %v806_v20 = vsel %vm723_vm3, %v805_v6, %v804_v37  ;;  %v957_v47 = vor.u32 %v956_v49, %v955_v52  ;;  %v4634_v60 = vsub.s32 %v677_v26, %v680_v56  ;;  %v951_v63 = vor.u32 %v950_v51, %v949_v34 }
  0xb3   : > { %v809_v45 = vsel %vm4553_vm9, %v4151_v0, %v806_v20  ;;  %vm964_vm0 = vcmp.lt.s32.totalorder %v942_v10, 4  ;;  %v960_v4 = vor.u32 %v959_v53, %v958_v27  ;;  %vm961_vm1 = vcmp.lt.s32.totalorder %v942_v10, 1 }
  0xb4   : > { %3905 = vcosq.f32 %v809_v45  ;;  %v966_v5 = vsel %vm964_vm0, %v954_v58, 2102212464  ;;  %v4637_v7 = vand.u32 3, %v810_v12  ;;  %v683_v8 = vsub.s32 0, %v4634_v60 }
  0xb5   : > { %3907 = vsinq.f32 %v809_v45  ;;  %vm963_vm2 = vcmp.lt.s32.totalorder %v942_v10, 3  ;;  %vm962_vm3 = vcmp.lt.s32.totalorder %v942_v10, 2  ;;  %v970_v40 = vsel %vm964_vm0, %v957_v47, 920167782 }
  0xb6   : > { %v977_v28 = vshll.u32 %v937_v22, 8  ;;  %v167_v9 = vcvt.s32.f32 %v151_v33  ;;  %v3697_v25 = vmin.u32 %v683_v8, %v4634_v60  ;;  %v965_v39 = vsel %vm961_vm1, %v945_v61, %v948_v19 }
  0xb7   : > { %v967_v32 = vsel %vm963_vm2, %v951_v63, %v966_v5  ;;  %v969_v41 = vsel %vm961_vm1, %v948_v19, %v951_v63  ;;  %v815_v26 = vand.u32 3, %v814_v35  ;;  %v971_v12 = vsel %vm963_vm2, %v954_v58, %v970_v40  ;;  %v4656_v35 = vld [vmem:[%s5746_s1] ss:$0 sm:$0xff] }
  0xb8   : > { %v973_v29 = vsel %vm961_vm1, %v951_v63, %v954_v58  ;;  %v974_v16 = vsel %vm964_vm0, %v960_v4, 1326507024  ;;  %vm619_vm4 = vcmp.lt.s32.totalorder %v4395_v18, 0  ;;  %v685_v59 = vclz %v3697_v25 }
  0xb9   : > { %vm2475_vm5 = vcmp.eq.s32.totalorder %v4637_v7, 0  ;;  %v968_v55 = vsel %vm962_vm3, %v965_v39, %v967_v32  ;;  %v972_v15 = vsel %vm962_vm3, %v969_v41, %v971_v12  ;;  %v975_v24 = vsel %vm963_vm2, %v957_v47, %v974_v16 }
  0xba   : > { %v4659_v43 = vmul.f32 %v4656_v35, %v167_v9  ;;  %vm2474_vm6 = vcmp.lt.s32.totalorder %v4637_v7, 2  ;;  %v3698_v37 = vadd.s32 4294967294, %v685_v59  ;;  %v976_v34 = vsel %vm962_vm3, %v973_v29, %v975_v24 }
  0xbb   : > { %v4663_v14 = vmul.u32.u64.low %v977_v28, %v972_v15  ;;  %v4664_v52 = vmul.u32.u64.high %v977_v28, %v972_v15, %v4663_v14  ;;  %vm813_vm7 = vweird.f32 %v4151_v0  ;;  %vm816_vm8 = vcmp.lt.s32.totalorder %v815_v26, 2 }
  0xbc   : > { %vm2478_vm9 = vcmp.eq.s32.totalorder %v4637_v7, 2  ;;  %v4669_v62 = vmul.u32.u64.low %v977_v28, %v976_v34  ;;  %v4670_v51 = vmul.u32.u64.high %v977_v28, %v976_v34, %v4669_v62  ;;  %v673_v27 = vadd.s32 %v4568_v11, %v4575_v3 }
  0xbd   : > { %vm3699_vm10 = vcmp.lt.s32.totalorder %v3698_v37, 0  ;;  %v703_v6 = vsub.s32 4, %v4618_v38  ;;  %v828_v10 = vand.u32 2139095040, %v4659_v43  ;;  %v984_v49 = vmul.u32 %v977_v28, %v968_v55 }
  0xbe   : > { %v688_v36 = vsel %vm3699_vm10, 0, %v3698_v37  ;;  %v825_v53 = vand.u32 2147483647, %v4659_v43  ;;  %v136_v56 = vadd.s32 72, %v4000_v2  ;;  %v987_v20 = vadd.s32 1, %v4664_v52 }
  0xbf   : > { %v689_v22 = vsub.s32 32, %v688_v36  ;;  %v690_v61 = vshll.u32 %v4634_v60, %v688_v36  ;;  %v693_v33 = vsub.s32 4294967266, %v688_v36  ;;  %vm817_vm11 = vcmp.eq.s32.totalorder %v815_v26, 0 }
  0xc0   : > { %vm820_vm12 = vcmp.eq.s32.totalorder %v815_v26, 2  ;;  %vm986_vm13 = vc.u32 %v4670_v51, %v4663_v14  ;;  %v829_v11 = vshrl.u32 %v828_v10, 23  ;;  %v704_v47 = vsel %vm619_vm4, %v703_v6, %v4618_v38 }
  0xc1   : > { %v3906_v3 = vpop.eup %3905  ;;  %v691_v19 = vshrl.u32 %v673_v27, %v689_v22  ;;  %v694_v58 = vadd.s32 127, %v693_v33  ;;  %v988_v45 = vsel %vm986_vm13, %v987_v20, %v4664_v52  ;;  %v154_v8 = vadd.s32 %v3998_v1, %v136_v56 }
  0xc2   : > { %v3908_v63 = vpop.eup %3907  ;;  %v821_v60 = vxor.u32 2147483648, %v3906_v3  ;;  %v989_v4 = vadd.s32 %v988_v45, %v984_v49  ;;  %v3704_v5 = vadd.s32 4294967169, %v829_v11  ;;  %v832_v25 = vand.u32 8388607, %v825_v53 }
  0xc3   : > { %v818_v40 = vxor.u32 2147483648, %v3908_v63  ;;  %v692_v28 = vor.u32 %v691_v19, %v690_v61  ;;  %v695_v9 = vshll.u32 %v694_v58, 23  ;;  %vm4710_vm15 = vcmp.le.f32.partialorder %v617_v30, 0.7853982 }
  0xc4   : > { %v822_v39 = vsel %vm820_vm12, %v821_v60, %v3908_v63  ;;  %v2480_v32 = vsel %vm2478_vm9, %v821_v60, %v3908_v63  ;;  %v990_v38 = vadd.s32 536870912, %v989_v4  ;;  %v835_v41 = vadd.s32 1, %v3704_v5 }
  0xc5   : > { %v819_v12 = vsel %vm817_vm11, %v3906_v3, %v818_v40  ;;  %v2477_v29 = vsel %vm2475_vm5, %v3906_v3, %v818_v40  ;;  %v696_v16 = vor.u32 4788187, %v695_v9  ;;  %v699_v59 = vcvt.s32.f32 %v692_v28 }
  0xc6   : > { %v823_v55 = vsel %vm816_vm8, %v819_v12, %v822_v39  ;;  %v2481_v15 = vsel %vm2474_vm6, %v2477_v29, %v2480_v32  ;;  %v4698_v24 = vshrl.u32 %v990_v38, 30  ;;  %vm836_vm14 = vcmp.gt.s32.totalorder %v835_v41, 0 }
  0xc7   : > { %v4702_v37 = vsel %vm813_vm7, nan, %v823_v55  ;;  %v2482_v34 = vsel %vm813_vm7, nan, %v2481_v15  ;;  %v697_v52 = vand.u32 2147483647, %v696_v16  ;;  %v837_v62 = vsel %vm836_vm14, %v835_v41, 0 }
  0xc8   : > { %3539 = vrot.lane.b32.xlu1 %v2482_v34, %s3969_s15  ;;  %v992_v26 = vshll.u32 %v4698_v24, 30  ;;  %v839_v27 = vand.u32 31, %v837_v62  ;;  %v706_v10 = vsel %vm4710_vm15, 0, %v704_v47  ;;  %v833_v22 = vor.u32 8388608, %v832_v25 }
  0xc9   : > { %v700_v6 = vmul.f32 %v699_v59, %v697_v52  ;;  %v710_v56 = vadd.s32 3, %v706_v10  ;;  %v170_v61 = vcvt.s32.f32 %v154_v8  ;;  %v4730_v63 = vand.u32 3, %v706_v10 }
  0xca   : > { %v4716_v36 = vsub.s32 %v989_v4, %v992_v26  ;;  %v840_v0 = vsub.s32 32, %v839_v27  ;;  %v842_v20 = vshll.u32 %v3963_v42, %v839_v27  ;;  %v845_v30 = vshll.u32 %v3964_v44, %v839_v27 }
  0xcb   : > { %v701_v49 = vxor.u32 2147483648, %v700_v6  ;;  %v848_v11 = vshll.u32 %v3965_v46, %v839_v27  ;;  %v4733_v4 = vand.u32 3, %v710_v56  ;;  %v838_v5 = vshrl.u32 %v837_v62, 5 }
  0xcc   : > { %v995_v33 = vsub.s32 0, %v4716_v36  ;;  %v843_v19 = vshrl.u32 %v3964_v44, %v840_v0  ;;  %v846_v58 = vshrl.u32 %v3965_v46, %v840_v0  ;;  %v849_v47 = vshrl.u32 %v3966_v48, %v840_v0 }
  0xcd   : > { %v702_v3 = vsel %vm619_vm4, %v701_v49, %v700_v6  ;;  %v4736_v8 = vmul.f32 %v4656_v35, %v170_v61  ;;  %v985_v40 = vadd.s32 %v4663_v14, %v4670_v51  ;;  %v4740_v9 = vshll.u32 %v833_v22, 8 }
  0xce   : > { %v705_v45 = vsel %vm4710_vm15, %v4395_v18, %v702_v3  ;;  %v3709_v60 = vmin.u32 %v995_v33, %v4716_v36  ;;  %v844_v25 = vor.u32 %v843_v19, %v842_v20  ;;  %v847_v39 = vor.u32 %v846_v58, %v845_v30 }
  0xcf   : > { %3909 = vcosq.f32 %v705_v45  ;;  %v850_v32 = vor.u32 %v849_v47, %v848_v11  ;;  %v851_v38 = vshll.u32 %v3966_v48, %v839_v27  ;;  %v852_v12 = vshrl.u32 %v3967_v50, %v840_v0 }
  0xd0   : > { %3911 = vsinq.f32 %v705_v45  ;;  %v997_v28 = vclz %v3709_v60  ;;  %v854_v29 = vshll.u32 %v3967_v50, %v839_v27  ;;  %v855_v16 = vshrl.u32 %v3968_v57, %v840_v0 }
  0xd1   : > { %v841_v59 = vshrl.u32 %v3963_v42, %v840_v0  ;;  %vm857_vm0 = vcmp.lt.s32.totalorder %v838_v5, 1  ;;  %vm858_vm1 = vcmp.lt.s32.totalorder %v838_v5, 2  ;;  %v1140_v14 = vand.u32 2139095040, %v4736_v8 }
  0xd2   : > { %v3710_v41 = vadd.s32 4294967294, %v997_v28  ;;  %vm2375_vm2 = vcmp.eq.s32.totalorder %v4730_v63, 2  ;;  %vm931_vm3 = vcmp.lt.s32.totalorder %v4496_v54, 0  ;;  %v853_v51 = vor.u32 %v852_v12, %v851_v38 }
  0xd3   : > { %v856_v55 = vor.u32 %v855_v16, %v854_v29  ;;  %vm860_vm5 = vcmp.lt.s32.totalorder %v838_v5, 4  ;;  %vm2372_vm6 = vcmp.eq.s32.totalorder %v4730_v63, 0  ;;  %vm859_vm7 = vcmp.lt.s32.totalorder %v838_v5, 3 }
  0xd4   : > { %vm3711_vm4 = vcmp.lt.s32.totalorder %v3710_v41, 0  ;;  %v862_v34 = vsel %vm860_vm5, %v850_v32, 2102212464  ;;  %v865_v52 = vsel %vm857_vm0, %v844_v25, %v847_v39  ;;  %vm712_vm8 = vcmp.lt.s32.totalorder %v4733_v4, 2 }
  0xd5   : > { %v1000_v15 = vsel %vm3711_vm4, 0, %v3710_v41  ;;  %vm2371_vm9 = vcmp.lt.s32.totalorder %v4730_v63, 2  ;;  %v869_v7 = vsel %vm857_vm0, %v847_v39, %v850_v32  ;;  %vm709_vm10 = vweird.f32 %v4395_v18 }
  0xd6   : > { %v1001_v62 = vsub.s32 32, %v1000_v15  ;;  %v1002_v26 = vshll.u32 %v4716_v36, %v1000_v15  ;;  %v1005_v27 = vsub.s32 4294967266, %v1000_v15  ;;  %v861_v6 = vsel %vm857_vm0, %v841_v59, %v844_v25 }
  0xd7   : > { %v863_v10 = vsel %vm859_vm7, %v847_v39, %v862_v34  ;;  %v866_v0 = vsel %vm860_vm5, %v853_v51, 920167782  ;;  %v870_v49 = vsel %vm860_vm5, %v856_v55, 1326507024  ;;  %vm4764_vm11 = vcmp.le.f32.partialorder %v929_v13, 0.7853982 }
  0xd8   : > { %v1003_v36 = vshrl.u32 %v985_v40, %v1001_v62  ;;  %v1006_v22 = vadd.s32 127, %v1005_v27  ;;  %v867_v61 = vsel %vm859_vm7, %v850_v32, %v866_v0  ;;  %v871_v33 = vsel %vm859_vm7, %v853_v51, %v870_v49 }
  0xd9   : > { %v1015_v20 = vsub.s32 4, %v4698_v24  ;;  %v868_v30 = vsel %vm858_vm1, %v865_v52, %v867_v61  ;;  %v872_v11 = vsel %vm858_vm1, %v869_v7, %v871_v33  ;;  %v1141_v3 = vshrl.u32 %v1140_v14, 23 }
  0xda   : > { %v1004_v19 = vor.u32 %v1003_v36, %v1002_v26  ;;  %v1007_v58 = vshll.u32 %v1006_v22, 23  ;;  %v4774_v13 = vmul.u32.u64.low %v4740_v9, %v872_v11  ;;  %v4775_v47 = vmul.u32.u64.high %v4740_v9, %v872_v11, %v4774_v13 }
  0xdb   : > { %v864_v45 = vsel %vm858_vm1, %v861_v6, %v863_v10  ;;  %v4779_v60 = vmul.u32.u64.low %v4740_v9, %v868_v30  ;;  %v4780_v40 = vmul.u32.u64.high %v4740_v9, %v868_v30, %v4779_v60  ;;  %v3716_v28 = vadd.s32 4294967169, %v1141_v3 }
  0xdc   : > { %v3910_v25 = vpop.eup %3909  ;;  %vm713_vm12 = vcmp.eq.s32.totalorder %v4733_v4, 0  ;;  %vm716_vm13 = vcmp.eq.s32.totalorder %v4733_v4, 2  ;;  %v1008_v39 = vor.u32 4788187, %v1007_v58  ;;  %v1011_v32 = vcvt.s32.f32 %v1004_v19 }
  0xdd   : > { %v3912_v38 = vpop.eup %3911  ;;  %v717_v41 = vxor.u32 2147483648, %v3910_v25  ;;  %v1016_v5 = vsel %vm931_vm3, %v1015_v20, %v4698_v24  ;;  %v1137_v12 = vand.u32 2147483647, %v4736_v8  ;;  %v1147_v29 = vadd.s32 1, %v3716_v28 }
  0xde   : > { %v714_v16 = vxor.u32 2147483648, %v3912_v38  ;;  %v1009_v59 = vand.u32 2147483647, %v1008_v39  ;;  %v880_v14 = vmul.u32 %v4740_v9, %v864_v45  ;;  %vm882_vm14 = vc.u32 %v4775_v47, %v4779_v60 }
  0xdf   : > { %v718_v51 = vsel %vm716_vm13, %v717_v41, %v3912_v38  ;;  %v2377_v55 = vsel %vm2375_vm2, %v717_v41, %v3912_v38  ;;  %v883_v15 = vadd.s32 1, %v4780_v40  ;;  %vm1148_vm15 = vcmp.gt.s32.totalorder %v1147_v29, 0 }
  0xe0   : > { %v715_v24 = vsel %vm713_vm12, %v3910_v25, %v714_v16  ;;  %v2374_v34 = vsel %vm2372_vm6, %v3910_v25, %v714_v16  ;;  %v1012_v52 = vmul.f32 %v1011_v32, %v1009_v59  ;;  %v1149_v62 = vsel %vm1148_vm15, %v1147_v29, 0 }
  0xe1   : > { %v719_v9 = vsel %vm712_vm8, %v715_v24, %v718_v51  ;;  %v2378_v26 = vsel %vm2371_vm9, %v2374_v34, %v2377_v55  ;;  %v1018_v27 = vsel %vm4764_vm11, 0, %v1016_v5  ;;  %v884_v7 = vsel %vm882_vm14, %v883_v15, %v4780_v40 }
  0xe2   : > { %v4808_v6 = vsel %vm709_vm10, nan, %v719_v9  ;;  %v2379_v10 = vsel %vm709_vm10, nan, %v2378_v26  ;;  %v1013_v0 = vxor.u32 2147483648, %v1012_v52  ;;  %v885_v49 = vadd.s32 %v884_v7, %v880_v14 }
  0xe3   : > { %3537 = vrot.lane.b32.xlu0 %v2379_v10, %s3969_s15  ;;  %v1022_v4 = vadd.s32 3, %v1018_v27  ;;  %v1151_v36 = vand.u32 31, %v1149_v62  ;;  %v135_v63 = vadd.s32 64, %v4000_v2  ;;  %v1144_v33 = vand.u32 8388607, %v1137_v12 }
  0xe4   : > { %v1014_v22 = vsel %vm931_vm3, %v1013_v0, %v1012_v52  ;;  %v886_v61 = vadd.s32 536870912, %v885_v49  ;;  %v1150_v20 = vshrl.u32 %v1149_v62, 5  ;;  %v4827_v45 = vand.u32 3, %v1018_v27 }
  0xe5   : > { %v1017_v18 = vsel %vm4764_vm11, %v4496_v54, %v1014_v22  ;;  %v1152_v30 = vsub.s32 32, %v1151_v36  ;;  %v1154_v11 = vshll.u32 %v3963_v42, %v1151_v36  ;;  %v1157_v3 = vshll.u32 %v3964_v44, %v1151_v36 }
  0xe6   : > { %3913 = vcosq.f32 %v1017_v18  ;;  %v4823_v19 = vshrl.u32 %v886_v61, 30  ;;  %v1160_v58 = vshll.u32 %v3965_v46, %v1151_v36  ;;  %v1163_v13 = vshll.u32 %v3966_v48, %v1151_v36 }
  0xe7   : > { %3915 = vsinq.f32 %v1017_v18  ;;  %v1155_v40 = vshrl.u32 %v3964_v44, %v1152_v30  ;;  %v1158_v56 = vshrl.u32 %v3965_v46, %v1152_v30  ;;  %v1145_v25 = vor.u32 8388608, %v1144_v33 }
  0xe8   : > { %v888_v28 = vshll.u32 %v4823_v19, 30  ;;  %v1161_v39 = vshrl.u32 %v3966_v48, %v1152_v30  ;;  %v1164_v32 = vshrl.u32 %v3967_v50, %v1152_v30  ;;  %v1166_v41 = vshll.u32 %v3967_v50, %v1151_v36 }
  0xe9   : > { %v1156_v38 = vor.u32 %v1155_v40, %v1154_v11  ;;  %v1167_v5 = vshrl.u32 %v3968_v57, %v1152_v30  ;;  %vm1172_vm0 = vcmp.lt.s32.totalorder %v1150_v20, 4  ;;  %v1159_v16 = vor.u32 %v1158_v56, %v1157_v3 }
  0xea   : > { %v4836_v29 = vsub.s32 %v885_v49, %v888_v28  ;;  %v1162_v59 = vor.u32 %v1161_v39, %v1160_v58  ;;  %v1165_v14 = vor.u32 %v1164_v32, %v1163_v13  ;;  %v1023_v51 = vand.u32 3, %v1022_v4 }
  0xeb   : > { %v1153_v55 = vshrl.u32 %v3963_v42, %v1152_v30  ;;  %v1168_v15 = vor.u32 %v1167_v5, %v1166_v41  ;;  %vm1169_vm1 = vcmp.lt.s32.totalorder %v1150_v20, 1  ;;  %vm1171_vm2 = vcmp.lt.s32.totalorder %v1150_v20, 3 }
  0xec   : > { %v891_v24 = vsub.s32 0, %v4836_v29  ;;  %v1174_v34 = vsel %vm1172_vm0, %v1162_v59, 2102212464  ;;  %v153_v52 = vadd.s32 %v3998_v1, %v135_v63  ;;  %vm2680_vm3 = vcmp.lt.s32.totalorder %v4827_v45, 2 }
  0xed   : > { %vm1170_vm4 = vcmp.lt.s32.totalorder %v1150_v20, 2  ;;  %v1178_v62 = vsel %vm1172_vm0, %v1165_v14, 920167782  ;;  %v1182_v9 = vsel %vm1172_vm0, %v1168_v15, 1326507024  ;;  %v138_v26 = vadd.s32 88, %v4000_v2 }
  0xee   : > { %vm1021_vm5 = vweird.f32 %v4496_v54  ;;  %v3705_v27 = vmin.u32 %v891_v24, %v4836_v29  ;;  %v1177_v7 = vsel %vm1169_vm1, %v1156_v38, %v1159_v16  ;;  %v1181_v10 = vsel %vm1169_vm1, %v1159_v16, %v1162_v59 }
  0xef   : > { %v1185_v0 = vshll.u32 %v1145_v25, 8  ;;  %v1173_v49 = vsel %vm1169_vm1, %v1153_v55, %v1156_v38  ;;  %v1175_v4 = vsel %vm1171_vm2, %v1159_v16, %v1174_v34  ;;  %v1179_v36 = vsel %vm1171_vm2, %v1162_v59, %v1178_v62 }
  0xf0   : > { %v1183_v63 = vsel %vm1171_vm2, %v1165_v14, %v1182_v9  ;;  %vm1024_vm6 = vcmp.lt.s32.totalorder %v1023_v51, 2  ;;  %vm2681_vm7 = vcmp.eq.s32.totalorder %v4827_v45, 0  ;;  %vm2684_vm8 = vcmp.eq.s32.totalorder %v4827_v45, 2 }
  0xf1   : > { %v893_v22 = vclz %v3705_v27  ;;  %vm1025_vm9 = vcmp.eq.s32.totalorder %v1023_v51, 0  ;;  %v1180_v61 = vsel %vm1170_vm4, %v1177_v7, %v1179_v36  ;;  %v1184_v33 = vsel %vm1170_vm4, %v1181_v10, %v1183_v63 }
  0xf2   : > { %v169_v18 = vcvt.s32.f32 %v153_v52  ;;  %v1176_v11 = vsel %vm1170_vm4, %v1173_v49, %v1175_v4  ;;  %v4856_v3 = vmul.u32.u64.low %v1185_v0, %v1184_v33  ;;  %v4857_v58 = vmul.u32.u64.high %v1185_v0, %v1184_v33, %v4856_v3 }
  0xf3   : > { %v3706_v30 = vadd.s32 4294967294, %v893_v22  ;;  %v3914_v13 = vpop.eup %3913  ;;  %vm1028_vm10 = vcmp.eq.s32.totalorder %v1023_v51, 2  ;;  %v4859_v40 = vmul.u32.u64.low %v1185_v0, %v1180_v61  ;;  %v4860_v56 = vmul.u32.u64.high %v1185_v0, %v1180_v61, %v4859_v40 }
  0xf4   : > { %v156_v28 = vadd.s32 %v3998_v1, %v138_v26  ;;  %v3916_v25 = vpop.eup %3915  ;;  %v1029_v39 = vxor.u32 2147483648, %v3914_v13  ;;  %v881_v32 = vadd.s32 %v4779_v60, %v4775_v47  ;;  %v911_v20 = vsub.s32 4, %v4823_v19 }
  0xf5   : > { %vm3707_vm11 = vcmp.lt.s32.totalorder %v3706_v30, 0  ;;  %v1026_v38 = vxor.u32 2147483648, %v3916_v25  ;;  %v1192_v5 = vmul.u32 %v1185_v0, %v1176_v11  ;;  %v4868_v16 = vmul.f32 %v4656_v35, %v169_v18 }
  0xf6   : > { %v896_v41 = vsel %vm3707_vm11, 0, %v3706_v30  ;;  %v1030_v59 = vsel %vm1028_vm10, %v1029_v39, %v3916_v25  ;;  %v2686_v14 = vsel %vm2684_vm8, %v1029_v39, %v3916_v25  ;;  %v172_v34 = vcvt.s32.f32 %v156_v28 }
  0xf7   : > { %v897_v55 = vsub.s32 32, %v896_v41  ;;  %v898_v15 = vshll.u32 %v4836_v29, %v896_v41  ;;  %v1027_v24 = vsel %vm1025_vm9, %v3914_v13, %v1026_v38  ;;  %v2683_v47 = vsel %vm2681_vm7, %v3914_v13, %v1026_v38 }
  0xf8   : > { %v901_v60 = vsub.s32 4294967266, %v896_v41  ;;  %v1031_v52 = vsel %vm1024_vm6, %v1027_v24, %v1030_v59  ;;  %v2687_v62 = vsel %vm2680_vm3, %v2683_v47, %v2686_v14  ;;  %vm1194_vm12 = vc.u32 %v4857_v58, %v4859_v40 }
  0xf9   : > { %v899_v9 = vshrl.u32 %v881_v32, %v897_v55  ;;  %v4883_v26 = vsel %vm1021_vm5, nan, %v1031_v52  ;;  %v2688_v29 = vsel %vm1021_vm5, nan, %v2687_v62  ;;  %v1195_v7 = vadd.s32 1, %v4860_v56 }
  0xfa   : > { %v902_v27 = vadd.s32 127, %v901_v60  ;;  %3543 = vrot.lane.b32.xlu1 %v2688_v29, %s3969_s15  ;;  %v1036_v45 = vand.u32 2139095040, %v4868_v16  ;;  %vm827_vm13 = vcmp.lt.s32.totalorder %v4659_v43, 0  ;;  %v4893_v49 = vmul.f32 %v4656_v35, %v172_v34 }
  0xfb   : > { %v900_v51 = vor.u32 %v899_v9, %v898_v15  ;;  %v1196_v0 = vsel %vm1194_vm12, %v1195_v7, %v4860_v56  ;;  %v912_v54 = vsel %vm827_vm13, %v911_v20, %v4823_v19  ;;  %v1033_v36 = vand.u32 2147483647, %v4868_v16 }
  0xfc   : > { %v903_v10 = vshll.u32 %v902_v27, 23  ;;  %v1197_v4 = vadd.s32 %v1196_v0, %v1192_v5  ;;  %v1037_v63 = vshrl.u32 %v1036_v45, 23  ;;  %v1348_v33 = vand.u32 2139095040, %v4893_v49 }
  0xfd   : > { %v907_v61 = vcvt.s32.f32 %v900_v51  ;;  %vm4902_vm14 = vcmp.le.f32.partialorder %v825_v53, 0.7853982  ;;  %v1040_v28 = vand.u32 8388607, %v1033_v36  ;;  %v137_v39 = vadd.s32 80, %v4000_v2 }
  0xfe   : > { %v904_v22 = vor.u32 4788187, %v903_v10  ;;  %v1198_v30 = vadd.s32 536870912, %v1197_v4  ;;  %v3712_v11 = vadd.s32 4294967169, %v1037_v63  ;;  %v914_v19 = vsel %vm4902_vm14, 0, %v912_v54 }
  0xff   : > { %v1349_v13 = vshrl.u32 %v1348_v33, 23  ;;  %v918_v20 = vadd.s32 3, %v914_v19  ;;  %v1345_v53 = vand.u32 2147483647, %v4893_v49  ;;  %vm1139_vm0 = vcmp.lt.s32.totalorder %v4736_v8, 0 }
 0x100   : > { %v905_v3 = vand.u32 2147483647, %v904_v22  ;;  %v1199_v56 = vshrl.u32 %v1198_v30, 30  ;;  %v1043_v25 = vadd.s32 1, %v3712_v11  ;;  %v1041_v55 = vor.u32 8388608, %v1040_v28 }
 0x101   : > { %v3724_v41 = vadd.s32 4294967169, %v1349_v13  ;;  %v4916_v24 = vadd.s32 %v3998_v1, %v137_v39  ;;  %v4920_v60 = vand.u32 3, %v918_v20  ;;  %v4922_v34 = vand.u32 3, %v914_v19 }
 0x102   : > { %v908_v32 = vmul.f32 %v907_v61, %v905_v3  ;;  %v1200_v38 = vshll.u32 %v1199_v56, 30  ;;  %vm1044_vm15 = vcmp.gt.s32.totalorder %v1043_v25, 0  ;;  %v4926_v52 = vand.u32 8388607, %v1345_v53 }
 0x103   : > { %v1045_v59 = vsel %vm1044_vm15, %v1043_v25, 0  ;;  %v1223_v29 = vsub.s32 4, %v1199_v56  ;;  %v1355_v27 = vadd.s32 1, %v3724_v41  ;;  %v1193_v7 = vadd.s32 %v4859_v40, %v4857_v58 }
 0x104   : > { %v909_v5 = vxor.u32 2147483648, %v908_v32  ;;  %v4913_v14 = vsub.s32 %v1197_v4, %v1200_v38  ;;  %v1047_v15 = vand.u32 31, %v1045_v59  ;;  %v4936_v0 = vshll.u32 %v1041_v55, 8 }
 0x105   : > { %v171_v54 = vcvt.s32.f32 %v4916_v24  ;;  %v1046_v4 = vshrl.u32 %v1045_v59, 5  ;;  %v1353_v61 = vor.u32 8388608, %v4926_v52  ;;  %vm4944_vm1 = vcmp.le.f32.partialorder %v1137_v12, 0.7853982 }
 0x106   : > { %v910_v47 = vsel %vm827_vm13, %v909_v5, %v908_v32  ;;  %v1203_v9 = vsub.s32 0, %v4913_v14  ;;  %v1048_v51 = vsub.s32 32, %v1047_v15  ;;  %v1050_v45 = vshll.u32 %v3963_v42, %v1047_v15 }
 0x107   : > { %v913_v62 = vsel %vm4902_vm14, %v4659_v43, %v910_v47  ;;  %v1053_v22 = vshll.u32 %v3964_v44, %v1047_v15  ;;  %v1224_v33 = vsel %vm1139_vm0, %v1223_v29, %v1199_v56  ;;  %vm1356_vm2 = vcmp.gt.s32.totalorder %v1355_v27, 0 }
 0x108   : > { %3917 = vcosq.f32 %v913_v62  ;;  %v3717_v10 = vmin.u32 %v1203_v9, %v4913_v14  ;;  %v1051_v63 = vshrl.u32 %v3964_v44, %v1048_v51  ;;  %v1049_v18 = vshrl.u32 %v3963_v42, %v1048_v51 }
 0x109   : > { %3919 = vsinq.f32 %v913_v62  ;;  %v1054_v11 = vshrl.u32 %v3965_v46, %v1048_v51  ;;  %v1056_v3 = vshll.u32 %v3965_v46, %v1047_v15  ;;  %v1057_v19 = vshrl.u32 %v3966_v48, %v1048_v51 }
 0x10a   : > { %v1205_v40 = vclz %v3717_v10  ;;  %v1052_v30 = vor.u32 %v1051_v63, %v1050_v45  ;;  %vm924_vm3 = vcmp.eq.s32.totalorder %v4920_v60, 2  ;;  %vm2581_vm4 = vcmp.eq.s32.totalorder %v4922_v34, 2 }
 0x10b   : > { %v1059_v13 = vshll.u32 %v3966_v48, %v1047_v15  ;;  %v1060_v28 = vshrl.u32 %v3967_v50, %v1048_v51  ;;  %v1062_v56 = vshll.u32 %v3967_v50, %v1047_v15  ;;  %vm921_vm5 = vcmp.eq.s32.totalorder %v4920_v60, 0 }
 0x10c   : > { %v3718_v12 = vadd.s32 4294967294, %v1205_v40  ;;  %vm2578_vm6 = vcmp.eq.s32.totalorder %v4922_v34, 0  ;;  %v1055_v25 = vor.u32 %v1054_v11, %v1053_v22  ;;  %v1058_v39 = vor.u32 %v1057_v19, %v1056_v3 }
 0x10d   : > { %v1063_v32 = vshrl.u32 %v3968_v57, %v1048_v51  ;;  %vm1065_vm7 = vcmp.lt.s32.totalorder %v1046_v4, 1  ;;  %vm920_vm8 = vcmp.lt.s32.totalorder %v4920_v60, 2  ;;  %vm2577_vm9 = vcmp.lt.s32.totalorder %v4922_v34, 2 }
 0x10e   : > { %vm3719_vm10 = vcmp.lt.s32.totalorder %v3718_v12, 0  ;;  %v1061_v20 = vor.u32 %v1060_v28, %v1059_v13  ;;  %vm1066_vm11 = vcmp.lt.s32.totalorder %v1046_v4, 2  ;;  %vm1067_vm12 = vcmp.lt.s32.totalorder %v1046_v4, 3 }
 0x10f   : > { %vm917_vm13 = vweird.f32 %v4659_v43  ;;  %v1208_v38 = vsel %vm3719_vm10, 0, %v3718_v12  ;;  %v1064_v41 = vor.u32 %v1063_v32, %v1062_v56  ;;  %vm1068_vm14 = vcmp.lt.s32.totalorder %v1046_v4, 4 }
 0x110   : > { %v1069_v5 = vsel %vm1065_vm7, %v1049_v18, %v1052_v30  ;;  %v1209_v59 = vsub.s32 32, %v1208_v38  ;;  %v1210_v55 = vshll.u32 %v4913_v14, %v1208_v38  ;;  %v1213_v15 = vsub.s32 4294967266, %v1208_v38 }
 0x111   : > { %v1070_v47 = vsel %vm1068_vm14, %v1058_v39, 2102212464  ;;  %v1073_v9 = vsel %vm1065_vm7, %v1052_v30, %v1055_v25  ;;  %v1074_v29 = vsel %vm1068_vm14, %v1061_v20, 920167782  ;;  %v1077_v51 = vsel %vm1065_vm7, %v1055_v25, %v1058_v39 }
 0x112   : > { %v1071_v62 = vsel %vm1067_vm12, %v1055_v25, %v1070_v47  ;;  %v1211_v45 = vshrl.u32 %v1193_v7, %v1209_v59  ;;  %v1214_v10 = vadd.s32 127, %v1213_v15  ;;  %v1075_v22 = vsel %vm1067_vm12, %v1058_v39, %v1074_v29 }
 0x113   : > { %v1072_v63 = vsel %vm1066_vm11, %v1069_v5, %v1071_v62  ;;  %v4976_v14 = vsel %vm4944_vm1, 0, %v1224_v33  ;;  %v1076_v40 = vsel %vm1066_vm11, %v1073_v9, %v1075_v22  ;;  %v1078_v18 = vsel %vm1068_vm14, %v1064_v41, 1326507024 }
 0x114   : > { %v1357_v30 = vsel %vm1356_vm2, %v1355_v27, 0  ;;  %v1212_v3 = vor.u32 %v1211_v45, %v1210_v55  ;;  %v1215_v19 = vshll.u32 %v1214_v10, 23  ;;  %v1079_v7 = vsel %vm1067_vm12, %v1061_v20, %v1078_v18 }
 0x115   : > { %v3918_v11 = vpop.eup %3917  ;;  %v1088_v12 = vmul.u32 %v4936_v0, %v1072_v63  ;;  %v1080_v56 = vsel %vm1066_vm11, %v1077_v51, %v1079_v7  ;;  %v4985_v33 = vmul.u32.u64.low %v4936_v0, %v1076_v40  ;;  %v4986_v25 = vmul.u32.u64.high %v4936_v0, %v1076_v40, %v4985_v33 }
 0x116   : > { %v3920_v13 = vpop.eup %3919  ;;  %v925_v28 = vxor.u32 2147483648, %v3918_v11  ;;  %v1216_v32 = vor.u32 4788187, %v1215_v19  ;;  %v1219_v38 = vcvt.s32.f32 %v1212_v3  ;;  %v1359_v27 = vand.u32 31, %v1357_v30 }
 0x117   : > { %v922_v39 = vxor.u32 2147483648, %v3920_v13  ;;  %v4994_v5 = vmul.u32.u64.low %v4936_v0, %v1080_v56  ;;  %v4995_v59 = vmul.u32.u64.high %v4936_v0, %v1080_v56, %v4994_v5  ;;  %v1091_v29 = vadd.s32 1, %v4986_v25 }
 0x118   : > { %v926_v41 = vsel %vm924_vm3, %v925_v28, %v3920_v13  ;;  %v2583_v20 = vsel %vm2581_vm4, %v925_v28, %v3920_v13  ;;  %v1217_v15 = vand.u32 2147483647, %v1216_v32  ;;  %v1360_v47 = vsub.s32 32, %v1359_v27 }
 0x119   : > { %v923_v4 = vsel %vm921_vm5, %v3918_v11, %v922_v39  ;;  %v2580_v55 = vsel %vm2578_vm6, %v3918_v11, %v922_v39  ;;  %v1362_v51 = vshll.u32 %v3963_v42, %v1359_v27  ;;  %v5015_v63 = vshll.u32 %v1353_v61, 8 }
 0x11a   : > { %v927_v62 = vsel %vm920_vm8, %v923_v4, %v926_v41  ;;  %v2584_v9 = vsel %vm2577_vm9, %v2580_v55, %v2583_v20  ;;  %v1220_v10 = vmul.f32 %v1219_v38, %v1217_v15  ;;  %vm1090_vm15 = vc.u32 %v4995_v59, %v4985_v33 }
 0x11b   : > { %v5009_v0 = vsel %vm917_vm13, nan, %v927_v62  ;;  %v2585_v45 = vsel %vm917_vm13, nan, %v2584_v9  ;;  %v1358_v60 = vshrl.u32 %v1357_v30, 5  ;;  %v1363_v34 = vshrl.u32 %v3964_v44, %v1360_v47 }
 0x11c   : > { %3541 = vrot.lane.b32.xlu0 %v2585_v45, %s3969_s15  ;;  %v1365_v22 = vshll.u32 %v3964_v44, %v1359_v27  ;;  %v1221_v40 = vxor.u32 2147483648, %v1220_v10  ;;  %v1092_v18 = vsel %vm1090_vm15, %v1091_v29, %v4986_v25  ;;  %v1366_v43 = vshrl.u32 %v3965_v46, %v1360_v47 }
 0x11d   : > { %v1368_v11 = vshll.u32 %v3965_v46, %v1359_v27  ;;  %v1093_v52 = vadd.s32 %v1092_v18, %v1088_v12  ;;  %v1364_v61 = vor.u32 %v1363_v34, %v1362_v51  ;;  %v1369_v3 = vshrl.u32 %v3966_v48, %v1360_v47 }
 0x11e   : > { %v1371_v19 = vshll.u32 %v3966_v48, %v1359_v27  ;;  %v1222_v30 = vsel %vm1139_vm0, %v1221_v40, %v1220_v10  ;;  %v1367_v7 = vor.u32 %v1366_v43, %v1365_v22  ;;  %v1372_v13 = vshrl.u32 %v3967_v50, %v1360_v47 }
 0x11f   : > { %v1374_v28 = vshll.u32 %v3967_v50, %v1359_v27  ;;  %v1225_v56 = vsel %vm4944_vm1, %v4736_v8, %v1222_v30  ;;  %v1094_v25 = vadd.s32 536870912, %v1093_v52  ;;  %v1361_v12 = vshrl.u32 %v3963_v42, %v1360_v47 }
 0x120   : > { %v1375_v39 = vshrl.u32 %v3968_v57, %v1360_v47  ;;  %3921 = vcosq.f32 %v1225_v56  ;;  %v1370_v32 = vor.u32 %v1369_v3, %v1368_v11  ;;  %v1373_v38 = vor.u32 %v1372_v13, %v1371_v19 }
 0x121   : > { %vm1377_vm2 = vcmp.lt.s32.totalorder %v1358_v60, 1  ;;  %3923 = vsinq.f32 %v1225_v56  ;;  %v5036_v41 = vshrl.u32 %v1094_v25, 30  ;;  %vm1379_vm0 = vcmp.lt.s32.totalorder %v1358_v60, 3 }
 0x122   : > { %v1376_v20 = vor.u32 %v1375_v39, %v1374_v28  ;;  %v1230_v27 = vadd.s32 3, %v4976_v14  ;;  %vm1378_vm3 = vcmp.lt.s32.totalorder %v1358_v60, 2  ;;  %vm1380_vm4 = vcmp.lt.s32.totalorder %v1358_v60, 4 }
 0x123   : > { %v1385_v58 = vsel %vm1377_vm2, %v1364_v61, %v1367_v7  ;;  %v1096_v5 = vshll.u32 %v5036_v41, 30  ;;  %v1381_v4 = vsel %vm1377_vm2, %v1361_v12, %v1364_v61  ;;  %v1382_v55 = vsel %vm1380_vm4, %v1370_v32, 2102212464 }
 0x124   : > { %v1386_v15 = vsel %vm1380_vm4, %v1373_v38, 920167782  ;;  %v1383_v47 = vsel %vm1379_vm0, %v1367_v7, %v1382_v55  ;;  %v1389_v9 = vsel %vm1377_vm2, %v1367_v7, %v1370_v32  ;;  %v1390_v29 = vsel %vm1380_vm4, %v1376_v20, 1326507024 }
 0x125   : > { %v1387_v62 = vsel %vm1379_vm0, %v1370_v32, %v1386_v15  ;;  %v5042_v51 = vsub.s32 %v1093_v52, %v1096_v5  ;;  %v140_v10 = vadd.s32 104, %v4000_v2  ;;  %v1391_v34 = vsel %vm1379_vm0, %v1373_v38, %v1390_v29 }
 0x126   : > { %v1388_v45 = vsel %vm1378_vm3, %v1385_v58, %v1387_v62  ;;  %v5055_v18 = vmul.f32 %v4656_v35, %v171_v54  ;;  %v2885_v43 = vand.u32 3, %v4976_v14  ;;  %v1384_v52 = vsel %vm1378_vm3, %v1381_v4, %v1383_v47 }
 0x127   : > { %v5048_v22 = vmul.u32.u64.low %v5015_v63, %v1388_v45  ;;  %v5049_v40 = vmul.u32.u64.high %v5015_v63, %v1388_v45, %v5048_v22  ;;  %v1099_v11 = vsub.s32 0, %v5042_v51  ;;  %v1392_v61 = vsel %vm1378_vm3, %v1389_v9, %v1391_v34 }
 0x128   : > { %v1231_v3 = vand.u32 3, %v1230_v27  ;;  %v5062_v19 = vmul.u32.u64.low %v5015_v63, %v1392_v61  ;;  %v5063_v30 = vmul.u32.u64.high %v5015_v63, %v1392_v61, %v5062_v19  ;;  %vm1229_vm1 = vweird.f32 %v4736_v8 }
 0x129   : > { %v3713_v7 = vmin.u32 %v1099_v11, %v5042_v51  ;;  %v1400_v35 = vmul.u32 %v5015_v63, %v1384_v52  ;;  %v1403_v24 = vadd.s32 1, %v5049_v40  ;;  %v1244_v54 = vand.u32 2139095040, %v5055_v18 }
 0x12a   : > { %vm2886_vm5 = vcmp.lt.s32.totalorder %v2885_v43, 2  ;;  %vm2887_vm6 = vcmp.eq.s32.totalorder %v2885_v43, 0  ;;  %vm1035_vm7 = vcmp.lt.s32.totalorder %v4868_v16, 0  ;;  %v5072_v60 = vadd.s32 %v3998_v1, %v140_v10 }
 0x12b   : > { %v1101_v14 = vclz %v3713_v7  ;;  %vm1232_vm8 = vcmp.lt.s32.totalorder %v1231_v3, 2  ;;  %vm2890_vm9 = vcmp.eq.s32.totalorder %v2885_v43, 2  ;;  %vm1402_vm10 = vc.u32 %v5063_v30, %v5048_v22 }
 0x12c   : > { %v1245_v13 = vshrl.u32 %v1244_v54, 23  ;;  %vm1233_vm11 = vcmp.eq.s32.totalorder %v1231_v3, 0  ;;  %vm1236_vm12 = vcmp.eq.s32.totalorder %v1231_v3, 2  ;;  %v1404_v56 = vsel %vm1402_vm10, %v1403_v24, %v5049_v40 }
 0x12d   : > { %v3922_v28 = vpop.eup %3921  ;;  %v3714_v63 = vadd.s32 4294967294, %v1101_v14  ;;  %v1089_v39 = vadd.s32 %v4985_v33, %v4995_v59  ;;  %v1119_v32 = vsub.s32 4, %v5036_v41  ;;  %v1405_v38 = vadd.s32 %v1404_v56, %v1400_v35 }
 0x12e   : > { %v3924_v25 = vpop.eup %3923  ;;  %v1237_v12 = vxor.u32 2147483648, %v3922_v28  ;;  %v1241_v27 = vand.u32 2147483647, %v5055_v18  ;;  %v3720_v58 = vadd.s32 4294967169, %v1245_v13  ;;  %vm5104_vm15 = vcmp.le.f32.partialorder %v1033_v36, 0.7853982 }
 0x12f   : > { %v1234_v20 = vxor.u32 2147483648, %v3924_v25  ;;  %vm3715_vm13 = vcmp.lt.s32.totalorder %v3714_v63, 0  ;;  %v1406_v15 = vadd.s32 536870912, %v1405_v38  ;;  %v174_v14 = vcvt.s32.f32 %v5072_v60 }
 0x130   : > { %v1238_v5 = vsel %vm1236_vm12, %v1237_v12, %v3924_v25  ;;  %v2892_v4 = vsel %vm2890_vm9, %v1237_v12, %v3924_v25  ;;  %v1104_v55 = vsel %vm3715_vm13, 0, %v3714_v63  ;;  %v1251_v52 = vadd.s32 1, %v3720_v58 }
 0x131   : > { %v1235_v47 = vsel %vm1233_vm11, %v3922_v28, %v1234_v20  ;;  %v2889_v62 = vsel %vm2887_vm6, %v3922_v28, %v1234_v20  ;;  %v1105_v9 = vsub.s32 32, %v1104_v55  ;;  %v1106_v33 = vshll.u32 %v5042_v51, %v1104_v55 }
 0x132   : > { %v1239_v59 = vsel %vm1232_vm8, %v1235_v47, %v1238_v5  ;;  %v2893_v29 = vsel %vm2886_vm5, %v2889_v62, %v2892_v4  ;;  %v1109_v45 = vsub.s32 4294967266, %v1104_v55  ;;  %v5087_v10 = vshrl.u32 %v1406_v15, 30  ;;  %v5126_v4 = vld [vmem:[%s5746_s1] ss:$0 sm:$0xff] }
 0x133   : > { %v5091_v34 = vsel %vm1229_vm1, nan, %v1239_v59  ;;  %v2894_v40 = vsel %vm1229_vm1, nan, %v2893_v29  ;;  %v1107_v11 = vshrl.u32 %v1089_v39, %v1105_v9  ;;  %v1120_v51 = vsel %vm1035_vm7, %v1119_v32, %v5036_v41 }
 0x134   : > { %3547 = vrot.lane.b32.xlu1 %v2894_v40, %s3969_s15  ;;  %v1110_v61 = vadd.s32 127, %v1109_v45  ;;  %v1408_v43 = vshll.u32 %v5087_v10, 30  ;;  %v1248_v3 = vand.u32 8388607, %v1241_v27  ;;  %vm1252_vm14 = vcmp.gt.s32.totalorder %v1251_v52, 0 }
 0x135   : > { %v1108_v19 = vor.u32 %v1107_v11, %v1106_v33  ;;  %v1253_v24 = vsel %vm1252_vm14, %v1251_v52, 0  ;;  %v1122_v41 = vsel %vm5104_vm15, 0, %v1120_v51  ;;  %v5129_v55 = vmul.f32 %v5126_v4, %v174_v14 }
 0x136   : > { %v1111_v7 = vshll.u32 %v1110_v61, 23  ;;  %v5108_v35 = vsub.s32 %v1405_v38, %v1408_v43  ;;  %v1255_v54 = vand.u32 31, %v1253_v24  ;;  %v1249_v56 = vor.u32 8388608, %v1248_v3 }
 0x137   : > { %v1115_v28 = vcvt.s32.f32 %v1108_v19  ;;  %v1126_v25 = vadd.s32 3, %v1122_v41  ;;  %v5115_v32 = vand.u32 3, %v1122_v41  ;;  %v1401_v38 = vadd.s32 %v5048_v22, %v5063_v30 }
 0x138   : > { %v1112_v13 = vor.u32 4788187, %v1111_v7  ;;  %v1411_v63 = vsub.s32 0, %v5108_v35  ;;  %v1256_v36 = vsub.s32 32, %v1255_v54  ;;  %v1258_v12 = vshll.u32 %v3963_v42, %v1255_v54 }
 0x139   : > { %v1261_v60 = vshll.u32 %v3964_v44, %v1255_v54  ;;  %v1264_v5 = vshll.u32 %v3965_v46, %v1255_v54  ;;  %v1254_v62 = vshrl.u32 %v1253_v24, 5  ;;  %v5131_v22 = vshll.u32 %v1249_v56, 8 }
 0x13a   : > { %v1113_v39 = vand.u32 2147483647, %v1112_v13  ;;  %v3725_v20 = vmin.u32 %v1411_v63, %v5108_v35  ;;  %v1259_v58 = vshrl.u32 %v3964_v44, %v1256_v36  ;;  %v1257_v30 = vshrl.u32 %v3963_v42, %v1256_v36 }
 0x13b   : > { %v1262_v33 = vshrl.u32 %v3965_v46, %v1256_v36  ;;  %v1265_v59 = vshrl.u32 %v3966_v48, %v1256_v36  ;;  %v1267_v40 = vshll.u32 %v3966_v48, %v1255_v54  ;;  %v1268_v11 = vshrl.u32 %v3967_v50, %v1256_v36 }
 0x13c   : > { %v1116_v15 = vmul.f32 %v1115_v28, %v1113_v39  ;;  %v1413_v47 = vclz %v3725_v20  ;;  %v1260_v9 = vor.u32 %v1259_v58, %v1258_v12  ;;  %v1270_v51 = vshll.u32 %v3967_v50, %v1255_v54 }
 0x13d   : > { %v1263_v52 = vor.u32 %v1262_v33, %v1261_v60  ;;  %v1266_v61 = vor.u32 %v1265_v59, %v1264_v5  ;;  %v1271_v43 = vshrl.u32 %v3968_v57, %v1256_v36  ;;  %v1269_v19 = vor.u32 %v1268_v11, %v1267_v40 }
 0x13e   : > { %v1117_v29 = vxor.u32 2147483648, %v1116_v15  ;;  %v3726_v45 = vadd.s32 4294967294, %v1413_v47  ;;  %vm1273_vm0 = vcmp.lt.s32.totalorder %v1254_v62, 1  ;;  %vm1274_vm3 = vcmp.lt.s32.totalorder %v1254_v62, 2 }
 0x13f   : > { %v1272_v41 = vor.u32 %v1271_v43, %v1270_v51  ;;  %vm1275_vm4 = vcmp.lt.s32.totalorder %v1254_v62, 3  ;;  %vm1276_vm1 = vcmp.lt.s32.totalorder %v1254_v62, 4  ;;  %v1277_v28 = vsel %vm1273_vm0, %v1257_v30, %v1260_v9 }
 0x140   : > { %v1118_v3 = vsel %vm1035_vm7, %v1117_v29, %v1116_v15  ;;  %vm3727_vm2 = vcmp.lt.s32.totalorder %v3726_v45, 0  ;;  %v1278_v36 = vsel %vm1276_vm1, %v1266_v61, 2102212464  ;;  %v1281_v12 = vsel %vm1273_vm0, %v1260_v9, %v1263_v52 }
 0x141   : > { %v1121_v7 = vsel %vm5104_vm15, %v4868_v16, %v1118_v3  ;;  %v1416_v24 = vsel %vm3727_vm2, 0, %v3726_v45  ;;  %v1279_v8 = vsel %vm1275_vm4, %v1263_v52, %v1278_v36  ;;  %v1282_v39 = vsel %vm1276_vm1, %v1269_v19, 920167782 }
 0x142   : > { %3925 = vcosq.f32 %v1121_v7  ;;  %v1417_v14 = vsub.s32 32, %v1416_v24  ;;  %v1418_v13 = vshll.u32 %v5108_v35, %v1416_v24  ;;  %v1421_v54 = vsub.s32 4294967266, %v1416_v24 }
 0x143   : > { %3927 = vsinq.f32 %v1121_v7  ;;  %v1285_v20 = vsel %vm1273_vm0, %v1263_v52, %v1266_v61  ;;  %v1286_v58 = vsel %vm1276_vm1, %v1272_v41, 1326507024  ;;  %v1127_v60 = vand.u32 3, %v1126_v25 }
 0x144   : > { %v1419_v63 = vshrl.u32 %v1401_v38, %v1417_v14  ;;  %v1422_v56 = vadd.s32 127, %v1421_v54  ;;  %v1283_v15 = vsel %vm1275_vm4, %v1266_v61, %v1282_v39  ;;  %v1431_v47 = vsub.s32 4, %v5087_v10 }
 0x145   : > { %v1280_v30 = vsel %vm1274_vm3, %v1277_v28, %v1279_v8  ;;  %v1284_v38 = vsel %vm1274_vm3, %v1281_v12, %v1283_v15  ;;  %v1287_v33 = vsel %vm1275_vm4, %v1269_v19, %v1286_v58  ;;  %v1556_v45 = vand.u32 2139095040, %v5129_v55 }
 0x146   : > { %v1420_v5 = vor.u32 %v1419_v63, %v1418_v13  ;;  %v1423_v35 = vshll.u32 %v1422_v56, 23  ;;  %v1288_v29 = vsel %vm1274_vm3, %v1285_v20, %v1287_v33  ;;  %vm1125_vm5 = vweird.f32 %v4868_v16 }
 0x147   : > { %v5158_v25 = vmul.u32.u64.low %v5131_v22, %v1288_v29  ;;  %v5159_v40 = vmul.u32.u64.high %v5131_v22, %v1288_v29, %v5158_v25  ;;  %v5162_v11 = vmul.u32.u64.low %v5131_v22, %v1284_v38  ;;  %v5163_v52 = vmul.u32.u64.high %v5131_v22, %v1284_v38, %v5162_v11 }
 0x148   : > { %v1424_v9 = vor.u32 4788187, %v1423_v35  ;;  %v1427_v59 = vcvt.s32.f32 %v1420_v5  ;;  %vm5169_vm6 = vcmp.le.f32.partialorder %v1345_v53, 0.7853982  ;;  %vm1347_vm7 = vcmp.lt.s32.totalorder %v4893_v49, 0 }
 0x149   : > { %v1557_v51 = vshrl.u32 %v1556_v45, 23  ;;  %vm2783_vm8 = vcmp.lt.s32.totalorder %v5115_v32, 2  ;;  %vm2784_vm9 = vcmp.eq.s32.totalorder %v5115_v32, 0  ;;  %v1432_v43 = vsel %vm1347_vm7, %v1431_v47, %v5087_v10 }
 0x14a   : > { %v1425_v62 = vand.u32 2147483647, %v1424_v9  ;;  %v139_v3 = vadd.s32 96, %v4000_v2  ;;  %vm2787_vm10 = vcmp.eq.s32.totalorder %v5115_v32, 2  ;;  %v1296_v19 = vmul.u32 %v5131_v22, %v1280_v30 }
 0x14b   : > { %v3732_v7 = vadd.s32 4294967169, %v1557_v51  ;;  %vm1128_vm11 = vcmp.lt.s32.totalorder %v1127_v60, 2  ;;  %vm1129_vm12 = vcmp.eq.s32.totalorder %v1127_v60, 0  ;;  %vm1298_vm13 = vc.u32 %v5159_v40, %v5162_v11 }
 0x14c   : > { %v1428_v53 = vmul.f32 %v1427_v59, %v1425_v62  ;;  %v1299_v24 = vadd.s32 1, %v5163_v52  ;;  %vm1132_vm14 = vcmp.eq.s32.totalorder %v1127_v60, 2  ;;  %v1434_v10 = vsel %vm5169_vm6, 0, %v1432_v43 }
 0x14d   : > { %v1563_v14 = vadd.s32 1, %v3732_v7  ;;  %v1438_v54 = vadd.s32 3, %v1434_v10  ;;  %v1553_v22 = vand.u32 2147483647, %v5129_v55  ;;  %v157_v63 = vadd.s32 %v3998_v1, %v139_v3 }
 0x14e   : > { %v1429_v41 = vxor.u32 2147483648, %v1428_v53  ;;  %v1300_v28 = vsel %vm1298_vm13, %v1299_v24, %v5163_v52  ;;  %v5195_v58 = vand.u32 3, %v1434_v10 }
 0x14f   : > { %v3926_v13 = vpop.eup %3925  ;;  %v1301_v8 = vadd.s32 %v1300_v28, %v1296_v19  ;;  %vm1564_vm15 = vcmp.gt.s32.totalorder %v1563_v14, 0  ;;  %v5203_v33 = vand.u32 3, %v1438_v54  ;;  %v1560_v61 = vand.u32 8388607, %v1553_v22 }
 0x150   : > { %v3928_v56 = vpop.eup %3927  ;;  %v1133_v36 = vxor.u32 2147483648, %v3926_v13  ;;  %v1430_v12 = vsel %vm1347_vm7, %v1429_v41, %v1428_v53  ;;  %v1565_v5 = vsel %vm1564_vm15, %v1563_v14, 0  ;;  %v173_v32 = vcvt.s32.f32 %v157_v63 }
 0x151   : > { %v1130_v39 = vxor.u32 2147483648, %v3928_v56  ;;  %v1433_v20 = vsel %vm5169_vm6, %v4893_v49, %v1430_v12  ;;  %v1302_v47 = vadd.s32 536870912, %v1301_v8  ;;  %v1567_v45 = vand.u32 31, %v1565_v5 }
 0x152   : > { %v1134_v35 = vsel %vm1132_vm14, %v1133_v36, %v3928_v56  ;;  %v2789_v15 = vsel %vm2787_vm10, %v1133_v36, %v3928_v56  ;;  %3929 = vcosq.f32 %v1433_v20  ;;  %vm1444_vm2 = vcmp.eq.s32.totalorder %v5203_v33, 2 }
 0x153   : > { %v1131_v30 = vsel %vm1129_vm12, %v3926_v13, %v1130_v39  ;;  %v2786_v38 = vsel %vm2784_vm9, %v3926_v13, %v1130_v39  ;;  %3931 = vsinq.f32 %v1433_v20  ;;  %v5208_v29 = vshrl.u32 %v1302_v47, 30 }
 0x154   : > { %v1135_v9 = vsel %vm1128_vm11, %v1131_v30, %v1134_v35  ;;  %v2790_v59 = vsel %vm2783_vm8, %v2786_v38, %v2789_v15  ;;  %v1568_v62 = vsub.s32 32, %v1567_v45  ;;  %vm3096_vm0 = vcmp.eq.s32.totalorder %v5195_v58, 2 }
 0x155   : > { %v5212_v25 = vsel %vm1125_vm5, nan, %v1135_v9  ;;  %v2791_v52 = vsel %vm1125_vm5, nan, %v2790_v59  ;;  %v1304_v60 = vshll.u32 %v5208_v29, 30  ;;  %v1570_v51 = vshll.u32 %v3963_v42, %v1567_v45 }
 0x156   : > { %3545 = vrot.lane.b32.xlu0 %v2791_v52, %s3969_s15  ;;  %v1573_v43 = vshll.u32 %v3964_v44, %v1567_v45  ;;  %v1579_v16 = vshll.u32 %v3966_v48, %v1567_v45  ;;  %vm1441_vm3 = vcmp.eq.s32.totalorder %v5203_v33, 0  ;;  %vm3093_vm4 = vcmp.eq.s32.totalorder %v5195_v58, 0 }
 0x157   : > { %v5227_v3 = vsub.s32 %v1301_v8, %v1304_v60  ;;  %v5229_v53 = vshrl.u32 %v1565_v5, 5  ;;  %v1571_v19 = vshrl.u32 %v3964_v44, %v1568_v62  ;;  %v1576_v7 = vshll.u32 %v3965_v46, %v1567_v45 }
 0x158   : > { %vm1440_vm1 = vcmp.lt.s32.totalorder %v5203_v33, 2  ;;  %vm3092_vm5 = vcmp.lt.s32.totalorder %v5195_v58, 2  ;;  %v1561_v24 = vor.u32 8388608, %v1560_v61  ;;  %v1574_v41 = vshrl.u32 %v3965_v46, %v1568_v62 }
 0x159   : > { %v1577_v10 = vshrl.u32 %v3966_v48, %v1568_v62  ;;  %v1580_v14 = vshrl.u32 %v3967_v50, %v1568_v62  ;;  %vm1437_vm6 = vweird.f32 %v4893_v49  ;;  %v1307_v13 = vsub.s32 0, %v5227_v3 }
 0x15a   : > { %v1582_v54 = vshll.u32 %v3967_v50, %v1567_v45  ;;  %v5242_v28 = vmul.f32 %v5126_v4, %v173_v32  ;;  %v5245_v63 = vadd.s32 120, %v4000_v2  ;;  %v1572_v56 = vor.u32 %v1571_v19, %v1570_v51 }
 0x15b   : > { %v1575_v36 = vor.u32 %v1574_v41, %v1573_v43  ;;  %v1581_v12 = vor.u32 %v1580_v14, %v1579_v16  ;;  %v1583_v8 = vshrl.u32 %v3968_v57, %v1568_v62  ;;  %v3721_v39 = vmin.u32 %v1307_v13, %v5227_v3 }
 0x15c   : > { %v1569_v20 = vshrl.u32 %v3963_v42, %v1568_v62  ;;  %v1578_v5 = vor.u32 %v1577_v10, %v1576_v7  ;;  %vm1585_vm7 = vcmp.lt.s32.totalorder %v5229_v53, 1  ;;  %v1297_v35 = vadd.s32 %v5162_v11, %v5159_v40 }
 0x15d   : > { %vm1587_vm8 = vcmp.lt.s32.totalorder %v5229_v53, 3  ;;  %vm1588_vm9 = vcmp.lt.s32.totalorder %v5229_v53, 4  ;;  %v5255_v15 = vshll.u32 %v1561_v24, 8  ;;  %v1309_v47 = vclz %v3721_v39 }
 0x15e   : > { %v1584_v30 = vor.u32 %v1583_v8, %v1582_v54  ;;  %vm1586_vm10 = vcmp.lt.s32.totalorder %v5229_v53, 2  ;;  %v1452_v38 = vand.u32 2139095040, %v5242_v28  ;;  %v1327_v59 = vsub.s32 4, %v5208_v29 }
 0x15f   : > { %v3930_v9 = vpop.eup %3929  ;;  %v1590_v45 = vsel %vm1588_vm9, %v1578_v5, 2102212464  ;;  %v1593_v40 = vsel %vm1585_vm7, %v1572_v56, %v1575_v36  ;;  %v1594_v11 = vsel %vm1588_vm9, %v1581_v12, 920167782  ;;  %v3722_v60 = vadd.s32 4294967294, %v1309_v47 }
 0x160   : > { %v3932_v52 = vpop.eup %3931  ;;  %v1445_v61 = vxor.u32 2147483648, %v3930_v9  ;;  %v1589_v62 = vsel %vm1585_vm7, %v1569_v20, %v1572_v56  ;;  %v1595_v32 = vsel %vm1587_vm8, %v1578_v5, %v1594_v11  ;;  %v1591_v43 = vsel %vm1587_vm8, %v1575_v36, %v1590_v45 }
 0x161   : > { %v1442_v51 = vxor.u32 2147483648, %v3932_v52  ;;  %v1596_v16 = vsel %vm1586_vm10, %v1593_v40, %v1595_v32  ;;  %v1597_v19 = vsel %vm1585_vm7, %v1575_v36, %v1578_v5  ;;  %vm3723_vm11 = vcmp.lt.s32.totalorder %v3722_v60, 0 }
 0x162   : > { %v1446_v7 = vsel %vm1444_vm2, %v1445_v61, %v3932_v52  ;;  %v3098_v24 = vsel %vm3096_vm0, %v1445_v61, %v3932_v52  ;;  %v1598_v41 = vsel %vm1588_vm9, %v1584_v30, 1326507024  ;;  %v1312_v13 = vsel %vm3723_vm11, 0, %v3722_v60 }
 0x163   : > { %v1443_v10 = vsel %vm1441_vm3, %v3930_v9, %v1442_v51  ;;  %v3095_v14 = vsel %vm3093_vm4, %v3930_v9, %v1442_v51  ;;  %v1599_v54 = vsel %vm1587_vm8, %v1581_v12, %v1598_v41  ;;  %v1313_v8 = vsub.s32 32, %v1312_v13 }
 0x164   : > { %v1447_v56 = vsel %vm1440_vm1, %v1443_v10, %v1446_v7  ;;  %v3099_v36 = vsel %vm3092_vm5, %v3095_v14, %v3098_v24  ;;  %v1314_v39 = vshll.u32 %v5227_v3, %v1312_v13  ;;  %v1317_v47 = vsub.s32 4294967266, %v1312_v13 }
 0x165   : > { %v5295_v20 = vsel %vm1437_vm6, nan, %v1447_v56  ;;  %v3100_v5 = vsel %vm1437_vm6, nan, %v3099_v36  ;;  %v1600_v12 = vsel %vm1586_vm10, %v1597_v19, %v1599_v54  ;;  %v1315_v33 = vshrl.u32 %v1297_v35, %v1313_v8 }
 0x166   : > { %3551 = vrot.lane.b32.xlu1 %v3100_v5, %s3969_s15  ;;  %v1592_v58 = vsel %vm1586_vm10, %v1589_v62, %v1591_v43  ;;  %v5305_v30 = vmul.u32.u64.low %v5255_v15, %v1600_v12  ;;  %v5306_v3 = vmul.u32.u64.high %v5255_v15, %v1600_v12, %v5305_v30  ;;  %v1318_v9 = vadd.s32 127, %v1317_v47 }
 0x167   : > { %v5309_v45 = vmul.u32.u64.low %v5255_v15, %v1596_v16  ;;  %v5310_v40 = vmul.u32.u64.high %v5255_v15, %v1596_v16, %v5309_v45  ;;  %v1453_v49 = vshrl.u32 %v1452_v38, 23  ;;  %v1316_v11 = vor.u32 %v1315_v33, %v1314_v39 }
 0x168   : > { %vm1243_vm12 = vcmp.lt.s32.totalorder %v5055_v18, 0  ;;  %v1319_v52 = vshll.u32 %v1318_v9, 23  ;;  %v1608_v35 = vmul.u32 %v5255_v15, %v1592_v58  ;;  %v160_v60 = vadd.s32 %v3998_v1, %v5245_v63 }
 0x169   : > { %v3728_v61 = vadd.s32 4294967169, %v1453_v49  ;;  %v1328_v53 = vsel %vm1243_vm12, %v1327_v59, %v5208_v29  ;;  %vm1610_vm13 = vc.u32 %v5306_v3, %v5309_v45  ;;  %v1323_v32 = vcvt.s32.f32 %v1316_v11 }
 0x16a   : > { %v1320_v62 = vor.u32 4788187, %v1319_v52  ;;  %v1611_v38 = vadd.s32 1, %v5310_v40  ;;  %vm5325_vm14 = vcmp.le.f32.partialorder %v1241_v27, 0.7853982  ;;  %v176_v7 = vcvt.s32.f32 %v160_v60 }
 0x16b   : > { %v1459_v51 = vadd.s32 1, %v3728_v61  ;;  %v1449_v59 = vand.u32 2147483647, %v5242_v28  ;;  %v1330_v63 = vsel %vm5325_vm14, 0, %v1328_v53  ;;  %v141_v27 = vadd.s32 112, %v4000_v2 }
 0x16c   : > { %v1321_v29 = vand.u32 2147483647, %v1320_v62  ;;  %v1612_v15 = vsel %vm1610_vm13, %v1611_v38, %v5310_v40  ;;  %v1334_v10 = vadd.s32 3, %v1330_v63  ;;  %v5334_v54 = vand.u32 3, %v1330_v63 }
 0x16d   : > { %vm1460_vm15 = vcmp.gt.s32.totalorder %v1459_v51, 0  ;;  %v1613_v16 = vadd.s32 %v1612_v15, %v1608_v35  ;;  %v1456_v56 = vand.u32 8388607, %v1449_v59  ;;  %v5341_v47 = vmul.f32 %v5126_v4, %v176_v7 }
 0x16e   : > { %v1461_v19 = vsel %vm1460_vm15, %v1459_v51, 0  ;;  %v1324_v24 = vmul.f32 %v1323_v32, %v1321_v29  ;;  %vm1555_vm2 = vcmp.lt.s32.totalorder %v5129_v55, 0  ;;  %v5356_v53 = vand.u32 3, %v1334_v10 }
 0x16f   : > { %v1463_v41 = vand.u32 31, %v1461_v19  ;;  %v1614_v14 = vadd.s32 536870912, %v1613_v16  ;;  %v1462_v40 = vshrl.u32 %v1461_v19, 5  ;;  %v1457_v60 = vor.u32 8388608, %v1456_v56 }
 0x170   : > { %v1325_v13 = vxor.u32 2147483648, %v1324_v24  ;;  %vm5363_vm0 = vcmp.le.f32.partialorder %v1553_v22, 0.7853982  ;;  %v1764_v63 = vand.u32 2139095040, %v5341_v47  ;;  %vm1340_vm1 = vcmp.eq.s32.totalorder %v5356_v53, 2 }
 0x171   : > { %v1464_v36 = vsub.s32 32, %v1463_v41  ;;  %v1615_v8 = vshrl.u32 %v1614_v14, 30  ;;  %v1466_v39 = vshll.u32 %v3963_v42, %v1463_v41  ;;  %v1469_v5 = vshll.u32 %v3964_v44, %v1463_v41 }
 0x172   : > { %v1326_v12 = vsel %vm1243_vm12, %v1325_v13, %v1324_v24  ;;  %v1475_v58 = vshll.u32 %v3966_v48, %v1463_v41  ;;  %v1472_v49 = vshll.u32 %v3965_v46, %v1463_v41  ;;  %v1478_v61 = vshll.u32 %v3967_v50, %v1463_v41 }
 0x173   : > { %v1467_v2 = vshrl.u32 %v3964_v44, %v1464_v36  ;;  %v1470_v33 = vshrl.u32 %v3965_v46, %v1464_v36  ;;  %v1329_v30 = vsel %vm5325_vm14, %v5055_v18, %v1326_v12  ;;  %v1616_v9 = vshll.u32 %v1615_v8, 30 }
 0x174   : > { %3933 = vcosq.f32 %v1329_v30  ;;  %v1473_v11 = vshrl.u32 %v3966_v48, %v1464_v36  ;;  %v1476_v52 = vshrl.u32 %v3967_v50, %v1464_v36  ;;  %v1479_v51 = vshrl.u32 %v3968_v57, %v1464_v36 }
 0x175   : > { %3935 = vsinq.f32 %v1329_v30  ;;  %v5358_v35 = vsub.s32 %v1613_v16, %v1616_v9  ;;  %v1468_v62 = vor.u32 %v1467_v2, %v1466_v39  ;;  %v1471_v32 = vor.u32 %v1470_v33, %v1469_v5 }
 0x176   : > { %v1477_v38 = vor.u32 %v1476_v52, %v1475_v58  ;;  %v1639_v15 = vsub.s32 4, %v1615_v8  ;;  %vm1481_vm3 = vcmp.lt.s32.totalorder %v1462_v40, 1  ;;  %v1465_v16 = vshrl.u32 %v3963_v42, %v1464_v36 }
 0x177   : > { %v1619_v29 = vsub.s32 0, %v5358_v35  ;;  %v1474_v19 = vor.u32 %v1473_v11, %v1472_v49  ;;  %v1480_v7 = vor.u32 %v1479_v51, %v1478_v61  ;;  %vm1484_vm4 = vcmp.lt.s32.totalorder %v1462_v40, 4 }
 0x178   : > { %vm2993_vm5 = vcmp.eq.s32.totalorder %v5334_v54, 2  ;;  %vm1483_vm6 = vcmp.lt.s32.totalorder %v1462_v40, 3  ;;  %v5373_v24 = vshll.u32 %v1457_v60, 8  ;;  %vm1337_vm7 = vcmp.eq.s32.totalorder %v5356_v53, 0 }
 0x179   : > { %v3733_v22 = vmin.u32 %v1619_v29, %v5358_v35  ;;  %vm2990_vm8 = vcmp.eq.s32.totalorder %v5334_v54, 0  ;;  %vm1482_vm9 = vcmp.lt.s32.totalorder %v1462_v40, 2  ;;  %v1486_v41 = vsel %vm1484_vm4, %v1474_v19, 2102212464 }
 0x17a   : > { %v1489_v10 = vsel %vm1481_vm3, %v1468_v62, %v1471_v32  ;;  %v1490_v14 = vsel %vm1484_vm4, %v1477_v38, 920167782  ;;  %vm1336_vm10 = vcmp.lt.s32.totalorder %v5356_v53, 2  ;;  %vm2989_vm11 = vcmp.lt.s32.totalorder %v5334_v54, 2 }
 0x17b   : > { %v1621_v13 = vclz %v3733_v22  ;;  %v1640_v56 = vsel %vm1555_vm2, %v1639_v15, %v1615_v8  ;;  %v1765_v36 = vshrl.u32 %v1764_v63, 23  ;;  %v5385_v39 = vadd.s32 %v3998_v1, %v141_v27 }
 0x17c   : > { %vm1333_vm12 = vweird.f32 %v5055_v18  ;;  %v1485_v5 = vsel %vm1481_vm3, %v1465_v16, %v1468_v62  ;;  %v1491_v12 = vsel %vm1483_vm6, %v1474_v19, %v1490_v14  ;;  %v1493_v2 = vsel %vm1481_vm3, %v1471_v32, %v1474_v19 }
 0x17d   : > { %v1494_v33 = vsel %vm1484_vm4, %v1480_v7, 1326507024  ;;  %v3734_v58 = vadd.s32 4294967294, %v1621_v13  ;;  %v1487_v30 = vsel %vm1483_vm6, %v1471_v32, %v1486_v41  ;;  %v1492_v9 = vsel %vm1482_vm9, %v1489_v10, %v1491_v12 }
 0x17e   : > { %v1495_v8 = vsel %vm1483_vm6, %v1477_v38, %v1494_v33  ;;  %v1609_v1 = vadd.s32 %v5309_v45, %v5306_v3  ;;  %v5399_v49 = vmul.u32.u64.low %v5373_v24, %v1492_v9  ;;  %v5400_v11 = vmul.u32.u64.high %v5373_v24, %v1492_v9, %v5399_v49 }
 0x17f   : > { %v1496_v27 = vsel %vm1482_vm9, %v1493_v2, %v1495_v8  ;;  %vm3735_vm13 = vcmp.lt.s32.totalorder %v3734_v58, 0  ;;  %v3740_v60 = vadd.s32 4294967169, %v1765_v36  ;;  %v1642_v32 = vsel %vm5363_vm0, 0, %v1640_v56 }
 0x180   : > { %v5404_v52 = vmul.u32.u64.low %v5373_v24, %v1496_v27  ;;  %v5405_v61 = vmul.u32.u64.high %v5373_v24, %v1496_v27, %v5404_v52  ;;  %v1624_v62 = vsel %vm3735_vm13, 0, %v3734_v58  ;;  %v1488_v38 = vsel %vm1482_vm9, %v1485_v5, %v1487_v30 }
 0x181   : > { %v175_v3 = vcvt.s32.f32 %v5385_v39  ;;  %v3934_v45 = vpop.eup %3933  ;;  %v1625_v51 = vsub.s32 32, %v1624_v62  ;;  %v1626_v29 = vshll.u32 %v5358_v35, %v1624_v62  ;;  %v1629_v15 = vsub.s32 4294967266, %v1624_v62 }
 0x182   : > { %v1771_v63 = vadd.s32 1, %v3740_v60  ;;  %v3936_v16 = vpop.eup %3935  ;;  %v1341_v19 = vxor.u32 2147483648, %v3934_v45  ;;  %v1646_v7 = vadd.s32 3, %v1642_v32  ;;  %v1507_v22 = vadd.s32 1, %v5400_v11 }
 0x183   : > { %v1761_v41 = vand.u32 2147483647, %v5341_v47  ;;  %v1338_v10 = vxor.u32 2147483648, %v3936_v16  ;;  %v1627_v14 = vshrl.u32 %v1609_v1, %v1625_v51  ;;  %v1630_v13 = vadd.s32 127, %v1629_v15 }
 0x184   : > { %v1504_v40 = vmul.u32 %v5373_v24, %v1488_v38  ;;  %v1342_v56 = vsel %vm1340_vm1, %v1341_v19, %v3936_v16  ;;  %v2995_v35 = vsel %vm2993_vm5, %v1341_v19, %v3936_v16  ;;  %vm1506_vm14 = vc.u32 %v5405_v61, %v5399_v49 }
 0x185   : > { %vm1772_vm15 = vcmp.gt.s32.totalorder %v1771_v63, 0  ;;  %v1339_v36 = vsel %vm1337_vm7, %v3934_v45, %v1338_v10  ;;  %v2992_v39 = vsel %vm2990_vm8, %v3934_v45, %v1338_v10  ;;  %v1628_v5 = vor.u32 %v1627_v14, %v1626_v29 }
 0x186   : > { %v1631_v12 = vshll.u32 %v1630_v13, 23  ;;  %v1343_v24 = vsel %vm1336_vm10, %v1339_v36, %v1342_v56  ;;  %v2996_v2 = vsel %vm2989_vm11, %v2992_v39, %v2995_v35  ;;  %v1508_v33 = vsel %vm1506_vm14, %v1507_v22, %v5400_v11 }
 0x187   : > { %v1773_v58 = vsel %vm1772_vm15, %v1771_v63, 0  ;;  %v5432_v30 = vsel %vm1333_vm12, nan, %v1343_v24  ;;  %v2997_v9 = vsel %vm1333_vm12, nan, %v2996_v2  ;;  %v1635_v1 = vcvt.s32.f32 %v1628_v5 }
 0x188   : > { %v1632_v8 = vor.u32 4788187, %v1631_v12  ;;  %3549 = vrot.lane.b32.xlu0 %v2997_v9, %s3969_s15  ;;  %v1509_v27 = vadd.s32 %v1508_v33, %v1504_v40  ;;  %v1775_v53 = vand.u32 31, %v1773_v58  ;;  %v1768_v54 = vand.u32 8388607, %v1761_v41 }
 0x189   : > { %v5439_v38 = vand.u32 3, %v1646_v7  ;;  %v5441_v45 = vand.u32 3, %v1642_v32  ;;  %v5444_v18 = vmul.f32 %v5126_v4, %v175_v3  ;;  %v1774_v4 = vshrl.u32 %v1773_v58, 5 }
 0x18a   : > { %v1633_v52 = vand.u32 2147483647, %v1632_v8  ;;  %v1510_v60 = vadd.s32 536870912, %v1509_v27  ;;  %v1776_v11 = vsub.s32 32, %v1775_v53  ;;  %v1778_v29 = vshll.u32 %v3963_v42, %v1775_v53 }
 0x18b   : > { %v1781_v15 = vshll.u32 %v3964_v44, %v1775_v53  ;;  %v1787_v63 = vshll.u32 %v3966_v48, %v1775_v53  ;;  %v1784_v3 = vshll.u32 %v3965_v46, %v1775_v53  ;;  %v1769_v13 = vor.u32 8388608, %v1768_v54 }
 0x18c   : > { %v1636_v62 = vmul.f32 %v1635_v1, %v1633_v52  ;;  %v5446_v51 = vshrl.u32 %v1510_v60, 30  ;;  %v1779_v19 = vshrl.u32 %v3964_v44, %v1776_v11  ;;  %v1782_v7 = vshrl.u32 %v3965_v46, %v1776_v11 }
 0x18d   : > { %v1788_v32 = vshrl.u32 %v3967_v50, %v1776_v11  ;;  %v1785_v10 = vshrl.u32 %v3966_v48, %v1776_v11  ;;  %v1790_v40 = vshll.u32 %v3967_v50, %v1775_v53  ;;  %v1791_v56 = vshrl.u32 %v3968_v57, %v1776_v11 }
 0x18e   : > { %v1637_v16 = vxor.u32 2147483648, %v1636_v62  ;;  %v1512_v22 = vshll.u32 %v5446_v51, 30  ;;  %v1777_v39 = vshrl.u32 %v3963_v42, %v1776_v11  ;;  %v1660_v5 = vand.u32 2139095040, %v5444_v18 }
 0x18f   : > { %v1780_v12 = vor.u32 %v1779_v19, %v1778_v29  ;;  %v1783_v24 = vor.u32 %v1782_v7, %v1781_v15  ;;  %v1789_v2 = vor.u32 %v1788_v32, %v1787_v63  ;;  %v1786_v58 = vor.u32 %v1785_v10, %v1784_v3 }
 0x190   : > { %v1638_v14 = vsel %vm1555_vm2, %v1637_v16, %v1636_v62  ;;  %v5464_v36 = vsub.s32 %v1509_v27, %v1512_v22  ;;  %vm1793_vm2 = vcmp.lt.s32.totalorder %v1774_v4, 1  ;;  %v1792_v43 = vor.u32 %v1791_v56, %v1790_v40  ;;  %v3530_v56 = vpop.permute.xlu0 %3529 }
 0x191   : > { %v1641_v35 = vsel %vm5363_vm0, %v5129_v55, %v1638_v14  ;;  %vm1796_vm0 = vcmp.lt.s32.totalorder %v1774_v4, 4  ;;  %v5473_v9 = vshll.u32 %v1769_v13, 8  ;;  %vm1794_vm3 = vcmp.lt.s32.totalorder %v1774_v4, 2 }
 0x192   : > { %3937 = vcosq.f32 %v1641_v35  ;;  %v1515_v33 = vsub.s32 0, %v5464_v36  ;;  %vm1795_vm4 = vcmp.lt.s32.totalorder %v1774_v4, 3  ;;  %v1797_v1 = vsel %vm1793_vm2, %v1777_v39, %v1780_v12 }
 0x193   : > { %3939 = vsinq.f32 %v1641_v35  ;;  %v1798_v27 = vsel %vm1796_vm0, %v1786_v58, 2102212464  ;;  %v1801_v53 = vsel %vm1793_vm2, %v1780_v12, %v1783_v24  ;;  %v1802_v52 = vsel %vm1796_vm0, %v1789_v2, 920167782 }
 0x194   : > { %v3729_v8 = vmin.u32 %v1515_v33, %v5464_v36  ;;  %v1661_v60 = vshrl.u32 %v1660_v5, 23  ;;  %vm1652_vm1 = vcmp.eq.s32.totalorder %v5439_v38, 2  ;;  %vm3302_vm5 = vcmp.eq.s32.totalorder %v5441_v45, 2 }
 0x195   : > { %v1805_v11 = vsel %vm1793_vm2, %v1783_v24, %v1786_v58  ;;  %vm1649_vm6 = vcmp.eq.s32.totalorder %v5439_v38, 0  ;;  %vm3299_vm7 = vcmp.eq.s32.totalorder %v5441_v45, 0  ;;  %v1799_v62 = vsel %vm1795_vm4, %v1783_v24, %v1798_v27 }
 0x196   : > { %v1517_v54 = vclz %v3729_v8  ;;  %v1803_v29 = vsel %vm1795_vm4, %v1786_v58, %v1802_v52  ;;  %v1806_v15 = vsel %vm1796_vm0, %v1792_v43, 1326507024  ;;  %v3736_v63 = vadd.s32 4294967169, %v1661_v60 }
 0x197   : > { %vm1648_vm8 = vcmp.lt.s32.totalorder %v5439_v38, 2  ;;  %vm3298_vm9 = vcmp.lt.s32.totalorder %v5441_v45, 2  ;;  %vm1451_vm10 = vcmp.lt.s32.totalorder %v5242_v28, 0  ;;  %v1800_v19 = vsel %vm1794_vm3, %v1797_v1, %v1799_v62 }
 0x198   : > { %v3730_v16 = vadd.s32 4294967294, %v1517_v54  ;;  %v1804_v7 = vsel %vm1794_vm3, %v1801_v53, %v1803_v29  ;;  %v1807_v32 = vsel %vm1795_vm4, %v1789_v2, %v1806_v15  ;;  %vm1645_vm11 = vweird.f32 %v5129_v55 }
 0x199   : > { %v1808_v22 = vsel %vm1794_vm3, %v1805_v11, %v1807_v32  ;;  %v5505_v3 = vmul.u32.u64.low %v5473_v9, %v1804_v7  ;;  %v5506_v10 = vmul.u32.u64.high %v5473_v9, %v1804_v7, %v5505_v3  ;;  %vm3577_vm12 = vcmask 261120  }
 0x19a   : > { %v1505_v14 = vadd.s32 %v5399_v49, %v5405_v61  ;;  %vm3731_vm13 = vcmp.lt.s32.totalorder %v3730_v16, 0  ;;  %v5512_v13 = vmul.u32.u64.low %v5473_v9, %v1808_v22  ;;  %v5513_v40 = vmul.u32.u64.high %v5473_v9, %v1808_v22, %v5512_v13  ;;  %v5548_v22 = vpop.permute.xlu1 %3533 }
 0x19b   : > { %v1520_v35 = vsel %vm3731_vm13, 0, %v3730_v16  ;;  %v1816_v4 = vmul.u32 %v5473_v9, %v1800_v19  ;;  %v1657_v39 = vand.u32 2147483647, %v5444_v18  ;;  %v1667_v5 = vadd.s32 1, %v3736_v63 }
 0x19c   : > { %v1521_v12 = vsub.s32 32, %v1520_v35  ;;  %v1522_v24 = vshll.u32 %v5464_v36, %v1520_v35  ;;  %v1525_v2 = vsub.s32 4294967266, %v1520_v35  ;;  %v5520_v33 = vstv %s5478_s21 }
 0x19d   : > { %v1535_v49 = vsub.s32 4, %v5446_v51  ;;  %v1819_v61 = vadd.s32 1, %v5506_v10  ;;  %vm1668_vm14 = vcmp.gt.s32.totalorder %v1667_v5, 0  ;;  %v3578_v58 = vsel %vm3577_vm12, %v4313_v23, %v3530_v56 }
 0x19e   : > { %v1523_v9 = vshrl.u32 %v1505_v14, %v1521_v12  ;;  %v1526_v8 = vadd.s32 127, %v1525_v2  ;;  %vm1818_vm15 = vc.u32 %v5513_v40, %v5505_v3  ;;  %vm3611_vm2 = vcmask 523264  }
 0x19f   : > { %v3938_v43 = vpop.eup %3937  ;;  %v1820_v27 = vsel %vm1818_vm15, %v1819_v61, %v5506_v10  ;;  %v1669_v53 = vsel %vm1668_vm14, %v1667_v5, 0  ;;  %v3595_v23 = vmul.f32 %v5520_v33, %v3578_v58  ;;  %v1536_v15 = vsel %vm1451_vm10, %v1535_v49, %v5446_v51 }
 0x1a0   : > { %v3940_v36 = vpop.eup %3939  ;;  %v1653_v1 = vxor.u32 2147483648, %v3938_v43  ;;  %v1524_v60 = vor.u32 %v1523_v9, %v1522_v24  ;;  %v1527_v54 = vshll.u32 %v1526_v8, 23  ;;  %v1821_v11 = vadd.s32 %v1820_v27, %v1816_v4 }
 0x1a1   : > { %v1650_v52 = vxor.u32 2147483648, %v3940_v36  ;;  %v1671_v63 = vand.u32 31, %v1669_v53  ;;  %3612 = vst.msk [vmem:[%s5531_s25] sm:$0xff] %vm3611_vm2, %v3595_v23  ;;  %vm5563_vm0 = vcmp.le.f32.partialorder %v1449_v59, 0.7853982  ;;  %v1670_v23 = vshrl.u32 %v1669_v53, 5 }
 0x1a2   : > { %v1654_v62 = vsel %vm1652_vm1, %v1653_v1, %v3940_v36  ;;  %v3304_v29 = vsel %vm3302_vm5, %v1653_v1, %v3940_v36  ;;  %v1528_v7 = vor.u32 4788187, %v1527_v54  ;;  %v1531_v32 = vcvt.s32.f32 %v1524_v60  ;;  %v5582_v1 = vpop.permute.xlu1 %3535 }
 0x1a3   : > { %v1651_v16 = vsel %vm1649_vm6, %v3938_v43, %v1650_v52  ;;  %v3301_v19 = vsel %vm3299_vm7, %v3938_v43, %v1650_v52  ;;  %v1822_v51 = vadd.s32 536870912, %v1821_v11  ;;  %v1672_v13 = vsub.s32 32, %v1671_v63 }
 0x1a4   : > { %v1655_v10 = vsel %vm1648_vm8, %v1651_v16, %v1654_v62  ;;  %v3305_v14 = vsel %vm3298_vm9, %v3301_v19, %v3304_v29  ;;  %v1529_v4 = vand.u32 2147483647, %v1528_v7  ;;  %v1664_v5 = vand.u32 8388607, %v1657_v39 }
 0x1a5   : > { %v5556_v56 = vsel %vm1645_vm11, nan, %v1655_v10  ;;  %v3306_v35 = vsel %vm1645_vm11, nan, %v3305_v14  ;;  %v5567_v45 = vshrl.u32 %v1822_v51, 30  ;;  %v1538_v24 = vsel %vm5563_vm0, 0, %v1536_v15  ;;  %v3532_v15 = vpop.permute.xlu0 %3531 }
 0x1a6   : > { %3555 = vrot.lane.b32.xlu1 %v3306_v35, %s3969_s15  ;;  %v1532_v12 = vmul.f32 %v1531_v32, %v1529_v4  ;;  %v1674_v55 = vshll.u32 %v3963_v42, %v1671_v63  ;;  %v1675_v2 = vshrl.u32 %v3964_v44, %v1672_v13  ;;  %v1677_v59 = vshll.u32 %v3964_v44, %v1671_v63  ;;  %v3540_v10 = vpop.permute.xlu1 %3539 }
 0x1a7   : > { %v1824_v49 = vshll.u32 %v5567_v45, 30  ;;  %v1678_v61 = vshrl.u32 %v3965_v46, %v1672_v13  ;;  %v1680_v58 = vshll.u32 %v3965_v46, %v1671_v63  ;;  %v1681_v9 = vshrl.u32 %v3966_v48, %v1672_v13 }
 0x1a8   : > { %v1533_v43 = vxor.u32 2147483648, %v1532_v12  ;;  %v1683_v8 = vshll.u32 %v3966_v48, %v1671_v63  ;;  %v1684_v36 = vshrl.u32 %v3967_v50, %v1672_v13  ;;  %v1686_v52 = vshll.u32 %v3967_v50, %v1671_v63 }
 0x1a9   : > { %v5584_v27 = vsub.s32 %v1821_v11, %v1824_v49  ;;  %v1687_v44 = vshrl.u32 %v3968_v57, %v1672_v13  ;;  %v1542_v46 = vadd.s32 3, %v1538_v24  ;;  %v5590_v54 = vand.u32 3, %v1538_v24 }
 0x1aa   : > { %v1534_v60 = vsel %vm1451_vm10, %v1533_v43, %v1532_v12  ;;  %v1665_v62 = vor.u32 8388608, %v1664_v5  ;;  %v1673_v11 = vshrl.u32 %v3963_v42, %v1672_v13  ;;  %v1676_v53 = vor.u32 %v1675_v2, %v1674_v55  ;;  %v3538_v2 = vpop.permute.xlu0 %3537 }
 0x1ab   : > { %v1537_v48 = vsel %vm5563_vm0, %v5242_v28, %v1534_v60  ;;  %v1827_v29 = vsub.s32 0, %v5584_v27  ;;  %v1679_v50 = vor.u32 %v1678_v61, %v1677_v59  ;;  %v1682_v57 = vor.u32 %v1681_v9, %v1680_v58 }
 0x1ac   : > { %3941 = vcosq.f32 %v1537_v48  ;;  %v1685_v63 = vor.u32 %v1684_v36, %v1683_v8  ;;  %v1688_v19 = vor.u32 %v1687_v44, %v1686_v52  ;;  %vm1689_vm3 = vcmp.lt.s32.totalorder %v1670_v23, 1 }
 0x1ad   : > { %3943 = vsinq.f32 %v1537_v48  ;;  %v3741_v16 = vmin.u32 %v1827_v29, %v5584_v27  ;;  %v5598_v7 = vand.u32 3, %v1542_v46  ;;  %vm1691_vm4 = vcmp.lt.s32.totalorder %v1670_v23, 3 }
 0x1ae   : > { %vm1692_vm1 = vcmp.lt.s32.totalorder %v1670_v23, 4  ;;  %v1705_v32 = vshll.u32 %v1665_v62, 8  ;;  %v1817_v42 = vadd.s32 %v5505_v3, %v5513_v40  ;;  %vm1690_vm5 = vcmp.lt.s32.totalorder %v1670_v23, 2 }
 0x1af   : > { %v1829_v14 = vclz %v3741_v16  ;;  %v1693_v51 = vsel %vm1689_vm3, %v1673_v11, %v1676_v53  ;;  %v1694_v13 = vsel %vm1692_vm1, %v1682_v57, 2102212464  ;;  %v1697_v35 = vsel %vm1689_vm3, %v1676_v53, %v1679_v50 }
 0x1b0   : > { %v1698_v4 = vsel %vm1692_vm1, %v1685_v63, 920167782  ;;  %v1701_v38 = vsel %vm1689_vm3, %v1679_v50, %v1682_v57  ;;  %vm3199_vm6 = vcmp.eq.s32.totalorder %v5590_v54, 2  ;;  %v1695_v12 = vsel %vm1691_vm4, %v1679_v50, %v1694_v13 }
 0x1b1   : > { %v3742_v5 = vadd.s32 4294967294, %v1829_v14  ;;  %v1699_v24 = vsel %vm1691_vm4, %v1682_v57, %v1698_v4  ;;  %v1702_v55 = vsel %vm1692_vm1, %v1688_v19, 1326507024  ;;  %vm1545_vm7 = vcmp.eq.s32.totalorder %v5598_v7, 0 }
 0x1b2   : > { %vm3196_vm8 = vcmp.eq.s32.totalorder %v5590_v54, 0  ;;  %v1696_v3 = vsel %vm1690_vm5, %v1693_v51, %v1695_v12  ;;  %v1700_v40 = vsel %vm1690_vm5, %v1697_v35, %v1699_v24  ;;  %v1703_v49 = vsel %vm1691_vm4, %v1685_v63, %v1702_v55 }
 0x1b3   : > { %v3580_v59 = vsel %vm3577_vm12, %v4366_v21, %v5548_v22  ;;  %vm1544_vm9 = vcmp.lt.s32.totalorder %v5598_v7, 2  ;;  %vm3195_vm10 = vcmp.lt.s32.totalorder %v5590_v54, 2  ;;  %vm3743_vm11 = vcmp.lt.s32.totalorder %v3742_v5, 0  ;;  %v3544_v21 = vpop.permute.xlu1 %3543 }
 0x1b4   : > { %v1704_v61 = vsel %vm1690_vm5, %v1701_v38, %v1703_v49  ;;  %v5616_v58 = vmul.u32.u64.low %v1705_v32, %v1700_v40  ;;  %v5617_v43 = vmul.u32.u64.high %v1705_v32, %v1700_v40, %v5616_v58  ;;  %vm1541_vm13 = vweird.f32 %v5242_v28 }
 0x1b5   : > { %v1832_v9 = vsel %vm3743_vm11, 0, %v3742_v5  ;;  %v5621_v8 = vmul.u32.u64.low %v1705_v32, %v1704_v61  ;;  %v5622_v36 = vmul.u32.u64.high %v1705_v32, %v1704_v61, %v5621_v8  ;;  %v1712_v52 = vmul.u32 %v1705_v32, %v1696_v3 }
 0x1b6   : > { %v1833_v22 = vsub.s32 32, %v1832_v9  ;;  %v1834_v44 = vshll.u32 %v5584_v27, %v1832_v9  ;;  %v1837_v60 = vsub.s32 4294967266, %v1832_v9  ;;  %v3597_v23 = vmul.f32 %v5520_v33, %v3580_v59 }
 0x1b7   : > { %v3581_v46 = vsel %vm3577_vm12, %v4472_v17, %v5582_v1  ;;  %v3579_v62 = vsel %vm3577_vm12, %v4608_v31, %v3532_v15  ;;  %v3583_v48 = vsel %vm3577_vm12, %v4702_v37, %v3540_v10  ;;  %v3582_v29 = vsel %vm3577_vm12, %v4808_v6, %v3538_v2  ;;  %v3542_v17 = vpop.permute.xlu0 %3541  ;;  %v3548_v14 = vpop.permute.xlu1 %3547 }
 0x1b8   : > { %v1835_v11 = vshrl.u32 %v1817_v42, %v1833_v22  ;;  %v1838_v53 = vadd.s32 127, %v1837_v60  ;;  %v1715_v27 = vadd.s32 1, %v5617_v43  ;;  %3614 = vst.msk [vmem:[%s5531_s25 + $0x10] sm:$0xff] %vm3611_vm2, %v3597_v23  ;;  %v3598_v50 = vmul.f32 %v5520_v33, %v3581_v46 }
 0x1b9   : > { %vm1548_vm14 = vcmp.eq.s32.totalorder %v5598_v7, 2  ;;  %vm1714_vm15 = vc.u32 %v5622_v36, %v5616_v58  ;;  %v3596_v31 = vmul.f32 %v5520_v33, %v3579_v62  ;;  %v3600_v37 = vmul.f32 %v5520_v33, %v3583_v48  ;;  %v3942_v6 = vpop.eup %3941 }
 0x1ba   : > { %v1836_v1 = vor.u32 %v1835_v11, %v1834_v44  ;;  %v1839_v15 = vshll.u32 %v1838_v53, 23  ;;  %v1716_v57 = vsel %vm1714_vm15, %v1715_v27, %v5617_v43  ;;  %3615 = vst.msk [vmem:[%s5531_s25 + $0x18] sm:$0xff] %vm3611_vm2, %v3598_v50  ;;  %v3599_v63 = vmul.f32 %v5520_v33, %v3582_v29  ;;  %v3944_v16 = vpop.eup %3943 }
 0x1bb   : > { %v1549_v19 = vxor.u32 2147483648, %v3942_v6  ;;  %v1717_v32 = vadd.s32 %v1716_v57, %v1712_v52  ;;  %3613 = vst.msk [vmem:[%s5531_s25 + $0x8] sm:$0xff] %vm3611_vm2, %v3596_v31  ;;  %3617 = vst.msk [vmem:[%s5531_s25 + $0x28] sm:$0xff] %vm3611_vm2, %v3600_v37  ;;  %v3585_v10 = vsel %vm3577_vm12, %v4883_v26, %v3544_v21  ;;  %v3584_v42 = vsel %vm3577_vm12, %v5009_v0, %v3542_v17 }
 0x1bc   : > { %v1546_v51 = vxor.u32 2147483648, %v3944_v16  ;;  %v1840_v13 = vor.u32 4788187, %v1839_v15  ;;  %v1843_v35 = vcvt.s32.f32 %v1836_v1  ;;  %3616 = vst.msk [vmem:[%s5531_s25 + $0x20] sm:$0xff] %vm3611_vm2, %v3599_v63  ;;  %v3602_v4 = vmul.f32 %v5520_v33, %v3585_v10 }
 0x1bd   : > { %v1550_v38 = vsel %vm1548_vm14, %v1549_v19, %v3944_v16  ;;  %v3201_v5 = vsel %vm3199_vm6, %v1549_v19, %v3944_v16  ;;  %v1718_v12 = vadd.s32 536870912, %v1717_v32  ;;  %v3601_v26 = vmul.f32 %v5520_v33, %v3584_v42 }
 0x1be   : > { %v1547_v0 = vsel %vm1545_vm7, %v3942_v6, %v1546_v51  ;;  %v3198_v24 = vsel %vm3196_vm8, %v3942_v6, %v1546_v51  ;;  %v1841_v55 = vand.u32 2147483647, %v1840_v13  ;;  %3619 = vst.msk [vmem:[%s5531_s25 + $0x38] sm:$0xff] %vm3611_vm2, %v3602_v4  ;;  %v3587_v2 = vsel %vm3577_vm12, %v5091_v34, %v3548_v14 }
 0x1bf   : > { %v1551_v3 = vsel %vm1544_vm9, %v1547_v0, %v1550_v38  ;;  %v3202_v40 = vsel %vm3195_vm10, %v3198_v24, %v3201_v5  ;;  %v5676_v49 = vshrl.u32 %v1718_v12, 30  ;;  %3618 = vst.msk [vmem:[%s5531_s25 + $0x30] sm:$0xff] %vm3611_vm2, %v3601_v26  ;;  %v3604_v59 = vmul.f32 %v5520_v33, %v3587_v2 }
 0x1c0   : > { %v5683_v61 = vsel %vm1541_vm13, nan, %v1551_v3  ;;  %v3203_v43 = vsel %vm1541_vm13, nan, %v3202_v40  ;;  %v1844_v34 = vmul.f32 %v1843_v35, %v1841_v55  ;;  %vm1763_vm0 = vcmp.lt.s32.totalorder %v5341_v47, 0 }
 0x1c1   : > { %3553 = vrot.lane.b32.xlu0 %v3203_v43, %s3969_s15  ;;  %v1720_v54 = vshll.u32 %v5676_v49, 30  ;;  %3621 = vst.msk [vmem:[%s5531_s25 + $0x48] sm:$0xff] %vm3611_vm2, %v3604_v59  ;;  %vm1762_vm3 = vcmp.le.f32.partialorder %v1761_v41, 0.7853982  ;;  %v1847_v9 = vsub.s32 4, %v5567_v45  ;;  %v1713_v11 = vadd.s32 %v5616_v58, %v5622_v36 }
 0x1c2   : > { %v1845_v7 = vxor.u32 2147483648, %v1844_v34  ;;  %vm1853_vm10 = vweird.f32 %v5341_v47  ;;  %vm1659_vm11 = vcmp.lt.s32.totalorder %v5444_v18, 0  ;;  %vm1658_vm13 = vcmp.le.f32.partialorder %v1657_v39, 0.7853982 }
 0x1c3   : > { %v1721_v8 = vsub.s32 %v1717_v32, %v1720_v54  ;;  %v1848_v22 = vsel %vm1763_vm0, %v1847_v9, %v5567_v45  ;;  %v1743_v0 = vsub.s32 4, %v5676_v49 }
 0x1c4   : > { %v1846_v52 = vsel %vm1763_vm0, %v1845_v7, %v1844_v34  ;;  %v1850_v46 = vsel %vm1762_vm3, 0, %v1848_v22 }
 0x1c5   : > { %v1849_v28 = vsel %vm1762_vm3, %v5341_v47, %v1846_v52  ;;  %v1723_v21 = vsub.s32 0, %v1721_v8  ;;  %v1854_v62 = vadd.s32 3, %v1850_v46  ;;  %v3503_v53 = vand.u32 3, %v1850_v46 }
 0x1c6   : > { %3945 = vcosq.f32 %v1849_v28 }
 0x1c7   : > { %3947 = vsinq.f32 %v1849_v28  ;;  %v3737_v44 = vmin.u32 %v1723_v21, %v1721_v8  ;;  %v1855_v27 = vand.u32 3, %v1854_v62  ;;  %vm3508_vm5 = vcmp.eq.s32.totalorder %v3503_v53, 2 }
 0x1c8   : > { %v3546_v60 = vpop.permute.xlu0 %3545  ;;  %vm3504_vm7 = vcmp.lt.s32.totalorder %v3503_v53, 2  ;;  %vm3505_vm8 = vcmp.eq.s32.totalorder %v3503_v53, 0 }
 0x1c9   : > { %v1725_v23 = vclz %v3737_v44  ;;  %v3586_v41 = vsel %vm3577_vm12, %v5212_v25, %v3546_v60  ;;  %vm1860_vm1 = vcmp.eq.s32.totalorder %v1855_v27, 2  ;;  %vm1857_vm6 = vcmp.eq.s32.totalorder %v1855_v27, 0 }
 0x1ca   : > { %v3603_v29 = vmul.f32 %v5520_v33, %v3586_v41  ;;  %vm1856_vm9 = vcmp.lt.s32.totalorder %v1855_v27, 2 }
 0x1cb   : > { %v3738_v48 = vadd.s32 4294967294, %v1725_v23 }
 0x1cc   : > { %3620 = vst.msk [vmem:[%s5531_s25 + $0x40] sm:$0xff] %vm3611_vm2, %v3603_v29 }
 0x1cd   : > { %vm3739_vm4 = vcmp.lt.s32.totalorder %v3738_v48, 0 }
 0x1ce   : > { %v1728_v45 = vsel %vm3739_vm4, 0, %v3738_v48 }
 0x1cf   : > { %v1729_v50 = vsub.s32 32, %v1728_v45  ;;  %v1730_v17 = vshll.u32 %v1721_v8, %v1728_v45  ;;  %v1733_v31 = vsub.s32 4294967266, %v1728_v45 }
 0x1d1   : > { %v1731_v37 = vshrl.u32 %v1713_v11, %v1729_v50  ;;  %v1734_v6 = vadd.s32 127, %v1733_v31 }
 0x1d3   : > { %v3946_v1 = vpop.eup %3945  ;;  %v1732_v25 = vor.u32 %v1731_v37, %v1730_v17  ;;  %v1735_v15 = vshll.u32 %v1734_v6, 23 }
 0x1d4   : > { %v3948_v57 = vpop.eup %3947  ;;  %v1861_v63 = vxor.u32 2147483648, %v3946_v1 }
 0x1d5   : > { %v1858_v58 = vxor.u32 2147483648, %v3948_v57  ;;  %v1736_v36 = vor.u32 4788187, %v1735_v15  ;;  %v1739_v16 = vcvt.s32.f32 %v1732_v25 }
 0x1d6   : > { %v1862_v19 = vsel %vm1860_vm1, %v1861_v63, %v3948_v57  ;;  %v3510_v32 = vsel %vm3508_vm5, %v1861_v63, %v3948_v57  ;;  %vm1749_vm5 = vweird.f32 %v5444_v18 }
 0x1d7   : > { %v1859_v10 = vsel %vm1857_vm6, %v3946_v1, %v1858_v58  ;;  %v3507_v42 = vsel %vm3505_vm8, %v3946_v1, %v1858_v58  ;;  %v1737_v14 = vand.u32 2147483647, %v1736_v36 }
 0x1d8   : > { %v1863_v51 = vsel %vm1856_vm9, %v1859_v10, %v1862_v19  ;;  %v3511_v13 = vsel %vm3504_vm7, %v3507_v42, %v3510_v32  ;;  %v3552_v35 = vpop.permute.xlu1 %3551 }
 0x1d9   : > { %v1864_v4 = vsel %vm1853_vm10, nan, %v1863_v51  ;;  %v3512_v38 = vsel %vm1853_vm10, nan, %v3511_v13  ;;  %v1740_v5 = vmul.f32 %v1739_v16, %v1737_v14  ;;  %v3589_v12 = vsel %vm3577_vm12, %v5295_v20, %v3552_v35 }
 0x1da   : > { %3559 = vrot.lane.b32.xlu1 %v3512_v38, %s3969_s15  ;;  %v3606_v47 = vmul.f32 %v5520_v33, %v3589_v12  ;;  %v1744_v20 = vsel %vm1659_vm11, %v1743_v0, %v5676_v49 }
 0x1db   : > { %v1741_v26 = vxor.u32 2147483648, %v1740_v5  ;;  %v1746_v2 = vsel %vm1658_vm13, 0, %v1744_v20 }
 0x1dc   : > { %3623 = vst.msk [vmem:[%s5531_s25 + $0x58] sm:$0xff] %vm3611_vm2, %v3606_v47  ;;  %v1750_v3 = vadd.s32 3, %v1746_v2  ;;  %v3400_v59 = vand.u32 3, %v1746_v2 }
 0x1dd   : > { %v1742_v24 = vsel %vm1659_vm11, %v1741_v26, %v1740_v5 }
 0x1de   : > { %v1745_v55 = vsel %vm1658_vm13, %v5444_v18, %v1742_v24  ;;  %v1751_v40 = vand.u32 3, %v1750_v3  ;;  %vm3405_vm15 = vcmp.eq.s32.totalorder %v3400_v59, 2  ;;  %vm3402_vm3 = vcmp.eq.s32.totalorder %v3400_v59, 0 }
 0x1df   : > { %3949 = vcosq.f32 %v1745_v55  ;;  %vm3401_vm1 = vcmp.lt.s32.totalorder %v3400_v59, 2 }
 0x1e0   : > { %3951 = vsinq.f32 %v1745_v55  ;;  %vm1756_vm14 = vcmp.eq.s32.totalorder %v1751_v40, 2  ;;  %vm1753_vm0 = vcmp.eq.s32.totalorder %v1751_v40, 0  ;;  %vm1752_vm4 = vcmp.lt.s32.totalorder %v1751_v40, 2 }
 0x1ec   : > { %v3950_v43 = vpop.eup %3949 }
 0x1ed   : > { %v3952_v39 = vpop.eup %3951  ;;  %v1757_v34 = vxor.u32 2147483648, %v3950_v43 }
 0x1ee   : > { %v1754_v54 = vxor.u32 2147483648, %v3952_v39 }
 0x1ef   : > { %v1758_v7 = vsel %vm1756_vm14, %v1757_v34, %v3952_v39  ;;  %v3407_v49 = vsel %vm3405_vm15, %v1757_v34, %v3952_v39 }
 0x1f0   : > { %v1755_v9 = vsel %vm1753_vm0, %v3950_v43, %v1754_v54  ;;  %v3404_v8 = vsel %vm3402_vm3, %v3950_v43, %v1754_v54 }
 0x1f1   : > { %v1759_v52 = vsel %vm1752_vm4, %v1755_v9, %v1758_v7  ;;  %v3408_v28 = vsel %vm3401_vm1, %v3404_v8, %v3407_v49 }
 0x1f2   : > { %v1760_v21 = vsel %vm1749_vm5, nan, %v1759_v52  ;;  %v3409_v22 = vsel %vm1749_vm5, nan, %v3408_v28 }
 0x1f3   : > { %3557 = vrot.lane.b32.xlu0 %v3409_v22, %s3969_s15 }
 0x1fa   : > { %v3550_v44 = vpop.permute.xlu0 %3549 }
 0x1fb   : > { %v3588_v60 = vsel %vm3577_vm12, %v5432_v30, %v3550_v44 }
 0x1fc   : > { %v3605_v23 = vmul.f32 %v5520_v33, %v3588_v60 }
 0x1fe   : > { %3622 = vst.msk [vmem:[%s5531_s25 + $0x50] sm:$0xff] %vm3611_vm2, %v3605_v23 }
 0x218   : > { %v3556_v18 = vpop.permute.xlu1 %3555 }
 0x219   : > { %v3591_v46 = vsel %vm3577_vm12, %v5556_v56, %v3556_v18 }
 0x21a   : > { %v3608_v41 = vmul.f32 %v5520_v33, %v3591_v46 }
 0x21c   : > { %3625 = vst.msk [vmem:[%s5531_s25 + $0x68] sm:$0xff] %vm3611_vm2, %v3608_v41 }
 0x233   : > { %v3554_v62 = vpop.permute.xlu0 %3553 }
 0x234   : > { %v3590_v48 = vsel %vm3577_vm12, %v5683_v61, %v3554_v62 }
 0x235   : > { %v3607_v29 = vmul.f32 %v5520_v33, %v3590_v48 }
 0x237   : > { %3624 = vst.msk [vmem:[%s5531_s25 + $0x60] sm:$0xff] %vm3611_vm2, %v3607_v29 }
 0x24c   : > { %v3560_v30 = vpop.permute.xlu1 %3559 }
 0x24d   : > { %v3593_v11 = vsel %vm3577_vm12, %v1864_v4, %v3560_v30 }
 0x24e   : > { %v3610_v53 = vmul.f32 %v5520_v33, %v3593_v11 }
 0x250   : > { %3627 = vst.msk [vmem:[%s5531_s25 + $0x78] sm:$0xff] %vm3611_vm2, %v3610_v53 }
 0x265   : > { %v3558_v56 = vpop.permute.xlu0 %3557 }
 0x266   : > { %v3592_v45 = vsel %vm3577_vm12, %v1760_v21, %v3558_v56 }
 0x267   : > { %v3609_v27 = vmul.f32 %v5520_v33, %v3592_v45 }
 0x269   : > { %3626 = vst.msk [vmem:[%s5531_s25 + $0x70] sm:$0xff] %vm3611_vm2, %v3609_v27 }
 0x26a PF: > { %s13_s11 = sadd.s32 1, %s3961_s11  }
 0x26b   : > { %p10_p4 = scmp.ge.s32.totalorder %s13_s11, 4  }
 0x26d   :  { %12 = sbr.rel (!%p10_p4) target bundleno = 2 (0x2), region = 55 }

</bundles_post_ra>
